<compile_context>
chip_gen: v6e
topology: v6e:2x2x1
jax: 0.10.0
libtpu: 0.0.40
codegen_flags: <defaults>
</compile_context>

<pallas_src>
import functools

import jax
import jax.numpy as jnp
from jax.experimental import pallas as pl
from jax.experimental.pallas import tpu as pltpu

NEG_SLOPE = 0.2


def _round_up(a, b):
    return (a + b - 1) // b * b


def _vmem_estimate(tile_m, indim, H):
    x_buf = 2 * tile_m * indim * 4            # double-buffered f32 x tiles
    w_buf = H * indim * 2 + H * H * 2         # bf16 weights (single-buffered constants)
    b_buf = H * 128 * 4                       # (H, 3) bias columns, lane-padded
    o_buf = 2 * tile_m * 4                    # double-buffered (1, tile_m) output rows
    live = tile_m * indim * 2 + H * tile_m * (2 + 4 + 4)   # x bf16, h1 bf16, h2 f32 + temp
    return x_buf + w_buf + b_buf + o_buf + live


def _disc_kernel(x_ref, w1_ref, w2_ref, bias_ref, b3_ref, o_ref, *, act_dtype):
    # x_ref: (TM, indim) f32 (natural layout)    w1_ref: (H, indim) bf16
    # w2_ref: (H, H) bf16                        bias_ref: (H, 3) f32 = [b1 | b2 | w3]
    # b3_ref: (1,) f32 in SMEM                   o_ref: (1, TM) f32
    x = x_ref[...].astype(jnp.bfloat16)          # in-kernel cast, hidden under MXU work

    b1 = bias_ref[:, 0:1]
    b2 = bias_ref[:, 1:2]
    w3 = bias_ref[:, 2:3]

    # Layer 1: contract on indim -> h1^T of shape (H, TM).  The per-tile transpose of x is
    # folded into the MXU path instead of being a host-side transpose pass.
    h1 = jax.lax.dot_general(
        w1_ref[...], x,
        dimension_numbers=(((1,), (1,)), ((), ())),
        preferred_element_type=jnp.float32)
    # Bias + LeakyReLU (mul+max) in act_dtype; bf16 halves the VALU work on v6e/v7x and the
    # result feeds matmul-2 directly without a separate repack.
    h1 = h1.astype(act_dtype) + b1.astype(act_dtype)
    h1 = jnp.maximum(h1, NEG_SLOPE * h1)
    h1 = h1.astype(jnp.bfloat16)

    # Layer 2: (H, H) @ (H, TM) on the MXU, f32 accumulate.  Bias + LeakyReLU kept in f32
    # because h2 feeds the f32 layer-3 reduction over H.
    h2 = jnp.dot(w2_ref[...], h1, preferred_element_type=jnp.float32) + b2
    h2 = jnp.maximum(h2, NEG_SLOPE * h2)

    # Layer 3 (H -> 1): VPU multiply + sublane reduction in f32, lane-dense (1, TM) output.
    out = jnp.sum(h2 * w3, axis=0, keepdims=True) + b3_ref[0]
    o_ref[...] = out.astype(o_ref.dtype)


def _build_call(N_pad, tile_m, indim, H, act_dtype, vmem_limit_bytes, single_buffer_consts):
    def const_spec(shape):
        if single_buffer_consts:
            return pl.BlockSpec(shape, lambda i: (0, 0), pipeline_mode=pl.Buffered(1))
        return pl.BlockSpec(shape, lambda i: (0, 0))

    kernel = functools.partial(_disc_kernel, act_dtype=act_dtype)
    return pl.pallas_call(
        kernel,
        out_shape=jax.ShapeDtypeStruct((1, N_pad), jnp.float32),
        grid_spec=pltpu.PrefetchScalarGridSpec(
            num_scalar_prefetch=0,
            grid=(N_pad // tile_m,),
            in_specs=[
                pl.BlockSpec((tile_m, indim), lambda i: (i, 0)),     # x batch tile (f32)
                const_spec((H, indim)),                              # W1 (constant)
                const_spec((H, H)),                                  # W2 (constant)
                const_spec((H, 3)),                                  # [b1 | b2 | w3] columns
                pl.BlockSpec(memory_space=pltpu.MemorySpace.SMEM),   # b3 scalar
            ],
            out_specs=pl.BlockSpec((1, tile_m), lambda i: (0, i)),   # lane-dense output row
        ),
        compiler_params=pltpu.CompilerParams(
            dimension_semantics=("parallel",),
            vmem_limit_bytes=vmem_limit_bytes),
    )


def discriminator_forward(x, params, *, tile_m=1024, act_dtype=jnp.bfloat16):
    """x: (N, indim) float32. params in PyTorch nn.Linear layout. Returns (N,) float32."""
    w1, b1, w2, b2, w3, b3 = params
    H, indim = w1.shape
    N = x.shape[0]

    # Batch tile: multiple of 128 lanes, never over-padding small batches, and capped so the
    # parallel grid keeps >= 4 steps when the batch allows it (v7x megacore sharding).
    tile_m = _round_up(max(1, int(tile_m)), 128)
    tile_m = min(tile_m, max(128, _round_up(pl.cdiv(N, 4), 128)))
    tile_m = max(128, min(tile_m, _round_up(N, 128)))
    N_pad = _round_up(N, tile_m)

    x = x.astype(jnp.float32)
    x_pad = x if N_pad == N else jnp.pad(x, ((0, N_pad - N), (0, 0)))

    w1b = w1.astype(jnp.bfloat16)
    w2b = w2.astype(jnp.bfloat16)
    bias_cols = jnp.stack(
        [b1.reshape(-1), b2.reshape(-1), w3.reshape(-1)], axis=1).astype(jnp.float32)  # (H, 3)
    b3c = b3.reshape(1).astype(jnp.float32)

    vmem_limit = None
    est = _vmem_estimate(tile_m, indim, H)
    if est > 24 * (1 << 20):
        # Only needed for big tiles (e.g. tile_m >= 2048 on v5e); stay under v7x's 64 MiB.
        vmem_limit = min(int(est * 3 // 2), 64 * (1 << 20))

    args = (x_pad, w1b, w2b, bias_cols, b3c)
    try:
        out = _build_call(N_pad, tile_m, indim, H, act_dtype, vmem_limit, True)(*args)
    except Exception:
        # Fallback if pipeline_mode=pl.Buffered(1) is unsupported in this jax version.
        out = _build_call(N_pad, tile_m, indim, H, act_dtype, vmem_limit, False)(*args)

    return out.reshape(-1)[:N]


def init_params(key, indim, hidden):
    """Deterministic synthetic parameters, PyTorch nn.Linear layout and init."""
    ks = jax.random.split(key, 6)
    s1 = indim ** -0.5
    s2 = hidden ** -0.5
    w1 = jax.random.uniform(ks[0], (hidden, indim), jnp.float32, -s1, s1)
    b1 = jax.random.uniform(ks[1], (hidden,), jnp.float32, -s1, s1)
    w2 = jax.random.uniform(ks[2], (hidden, hidden), jnp.float32, -s2, s2)
    b2 = jax.random.uniform(ks[3], (hidden,), jnp.float32, -s2, s2)
    w3 = jax.random.uniform(ks[4], (1, hidden), jnp.float32, -s2, s2)
    b3 = jax.random.uniform(ks[5], (1,), jnp.float32, -s2, s2)
    return (w1, b1, w2, b2, w3, b3)


def reference_forward(x, params):
    """Pure f32 JAX reference matching the PyTorch module exactly."""
    w1, b1, w2, b2, w3, b3 = params
    lrelu = lambda v: jnp.maximum(v, NEG_SLOPE * v)
    h1 = lrelu(x @ w1.T + b1)
    h2 = lrelu(h1 @ w2.T + b2)
    return (h2 @ w3.T + b3).reshape(-1)


if __name__ == "__main__":
    key = jax.random.PRNGKey(0)
    k_x, k_p = jax.random.split(key)

    # Small shapes (real module defaults to hidden_dims=512); N deliberately not a multiple
    # of the tile so the padding path and a multi-step parallel grid are both exercised.
    N, indim, hidden = 600, 64, 128
    x = jax.random.normal(k_x, (N, indim), jnp.float32)
    params = init_params(k_p, indim, hidden)

    out = discriminator_forward(x, params, tile_m=256)
    out = jax.block_until_ready(out)

    ref = reference_forward(x, params)
    assert out.shape == (N,)
    # bf16 matmul inputs / bf16 layer-1 activations with f32 accumulation vs pure-f32 ref.
    assert jnp.allclose(out, ref, atol=3e-2, rtol=3e-2), "mismatch vs reference"

    print("KERNEL_OK")
</pallas_src>

<mosaic_0001>
module attributes {stable_mosaic.version = 11 : i64} {
  func.func @_disc_kernel(%arg0: i32, %arg1: memref<256x64xf32, #tpu.memory_space<vmem>>, %arg2: memref<128x64xbf16, #tpu.memory_space<vmem>>, %arg3: memref<128x128xbf16, #tpu.memory_space<vmem>>, %arg4: memref<128x3xf32, #tpu.memory_space<vmem>>, %arg5: memref<1xf32, #tpu.memory_space<smem>>, %arg6: memref<1x256xf32, #tpu.memory_space<vmem>>) attributes {dimension_semantics = [#tpu.dimension_semantics<parallel>], iteration_bounds = array<i64: 3>, scalar_prefetch = 0 : i64, scratch_operands = 0 : i64, tpu.core_type = #tpu.core_type<tc>, window_params = [{transform_indices = @transform_0, window_bounds = array<i64: 256, 64>}, {pipeline_mode = #tpu.pipeline_mode<synchronous>, transform_indices = @transform_1, window_bounds = array<i64: 128, 64>}, {pipeline_mode = #tpu.pipeline_mode<synchronous>, transform_indices = @transform_2, window_bounds = array<i64: 128, 128>}, {pipeline_mode = #tpu.pipeline_mode<synchronous>, transform_indices = @transform_3, window_bounds = array<i64: 128, 3>}, {transform_indices = @transform_4, window_bounds = array<i64: 1>}, {transform_indices = @transform_5, window_bounds = array<i64: 1, 256>}]} {
    %c0 = arith.constant 0 : index
    %c0_0 = arith.constant 0 : index
    %0 = vector.load %arg1[%c0, %c0_0] : memref<256x64xf32, #tpu.memory_space<vmem>>, vector<256x64xf32>
    %1 = arith.truncf %0 : vector<256x64xf32> to vector<256x64xbf16>
    %c0_1 = arith.constant 0 : index
    %c0_2 = arith.constant 0 : index
    %2 = vector.load %arg4[%c0_1, %c0_2] : memref<128x3xf32, #tpu.memory_space<vmem>>, vector<128x1xf32>
    %c0_3 = arith.constant 0 : index
    %c1 = arith.constant 1 : index
    %3 = vector.load %arg4[%c0_3, %c1] : memref<128x3xf32, #tpu.memory_space<vmem>>, vector<128x1xf32>
    %c0_4 = arith.constant 0 : index
    %c2 = arith.constant 2 : index
    %4 = vector.load %arg4[%c0_4, %c2] : memref<128x3xf32, #tpu.memory_space<vmem>>, vector<128x1xf32>
    %c0_5 = arith.constant 0 : index
    %c0_6 = arith.constant 0 : index
    %5 = vector.load %arg2[%c0_5, %c0_6] : memref<128x64xbf16, #tpu.memory_space<vmem>>, vector<128x64xbf16>
    %cst = arith.constant dense<0.000000e+00> : vector<128x256xf32>
    %6 = tpu.matmul %5, %1, %cst {dimension_numbers = #tpu.dot_dimension_numbers<[1], [1], [0], [0], [0, 0, 1, 0], [], []>} : vector<128x64xbf16>, vector<256x64xbf16>, vector<128x256xf32> -> vector<128x256xf32>
    %7 = arith.truncf %6 : vector<128x256xf32> to vector<128x256xbf16>
    %8 = arith.truncf %2 : vector<128x1xf32> to vector<128x1xbf16>
    %9 = vector.broadcast %8 : vector<128x1xbf16> to vector<128x256xbf16>
    %10 = arith.addf %7, %9 : vector<128x256xbf16>
    %cst_7 = arith.constant 2.001950e-01 : bf16
    %11 = vector.broadcast %cst_7 : bf16 to vector<128x256xbf16>
    %12 = arith.mulf %11, %10 : vector<128x256xbf16>
    %13 = arith.maximumf %10, %12 : vector<128x256xbf16>
    %c0_8 = arith.constant 0 : index
    %c0_9 = arith.constant 0 : index
    %14 = vector.load %arg3[%c0_8, %c0_9] : memref<128x128xbf16, #tpu.memory_space<vmem>>, vector<128x128xbf16>
    %cst_10 = arith.constant dense<0.000000e+00> : vector<128x256xf32>
    %15 = tpu.matmul %14, %13, %cst_10 {dimension_numbers = #tpu.dot_dimension_numbers<[1], [0], [0], [1], [0, 0, 1, 1], [], []>} : vector<128x128xbf16>, vector<128x256xbf16>, vector<128x256xf32> -> vector<128x256xf32>
    %16 = vector.broadcast %3 : vector<128x1xf32> to vector<128x256xf32>
    %17 = arith.addf %15, %16 : vector<128x256xf32>
    %cst_11 = arith.constant 2.000000e-01 : f32
    %18 = vector.broadcast %cst_11 : f32 to vector<128x256xf32>
    %19 = arith.mulf %18, %17 : vector<128x256xf32>
    %20 = arith.maximumf %17, %19 : vector<128x256xf32>
    %21 = vector.broadcast %4 : vector<128x1xf32> to vector<128x256xf32>
    %22 = arith.mulf %20, %21 : vector<128x256xf32>
    %cst_12 = arith.constant dense<0.000000e+00> : vector<256xf32>
    %23 = vector.multi_reduction <add>, %22, %cst_12 [0] : vector<128x256xf32> to vector<256xf32>
    %24 = vector.shape_cast %23 : vector<256xf32> to vector<1x256xf32>
    %c0_13 = arith.constant 0 : index
    %25 = memref.load %arg5[%c0_13] : memref<1xf32, #tpu.memory_space<smem>>
    %26 = vector.broadcast %25 : f32 to vector<1x256xf32>
    %27 = arith.addf %24, %26 : vector<1x256xf32>
    %c0_14 = arith.constant 0 : index
    %c0_15 = arith.constant 0 : index
    %28 = vector.load %arg6[%c0_14, %c0_15] : memref<1x256xf32, #tpu.memory_space<vmem>>, vector<1x256xf32>
    tpu.vector_store %arg6[%c0_14, %c0_15], %27 {strides = array<i32>} : memref<1x256xf32, #tpu.memory_space<vmem>>, vector<1x256xf32>,
    return
  }
  func.func @transform_0(%arg0: i32) -> (i32, i32) {
    %c0_i32 = arith.constant 0 : i32
    %c0_i32_0 = arith.constant 0 : i32
    return %arg0, %c0_i32 : i32, i32
  }
  func.func @transform_1(%arg0: i32) -> (i32, i32) {
    %c0_i32 = arith.constant 0 : i32
    %c0_i32_0 = arith.constant 0 : i32
    %c0_i32_1 = arith.constant 0 : i32
    return %c0_i32, %c0_i32_0 : i32, i32
  }
  func.func @transform_2(%arg0: i32) -> (i32, i32) {
    %c0_i32 = arith.constant 0 : i32
    %c0_i32_0 = arith.constant 0 : i32
    %c0_i32_1 = arith.constant 0 : i32
    return %c0_i32, %c0_i32_0 : i32, i32
  }
  func.func @transform_3(%arg0: i32) -> (i32, i32) {
    %c0_i32 = arith.constant 0 : i32
    %c0_i32_0 = arith.constant 0 : i32
    %c0_i32_1 = arith.constant 0 : i32
    return %c0_i32, %c0_i32_0 : i32, i32
  }
  func.func @transform_4(%arg0: i32) -> i32 {
    %c0_i32 = arith.constant 0 : i32
    %c0_i32_0 = arith.constant 0 : i32
    return %c0_i32 : i32
  }
  func.func @transform_5(%arg0: i32) -> (i32, i32) {
    %c0_i32 = arith.constant 0 : i32
    %c0_i32_0 = arith.constant 0 : i32
    return %c0_i32, %arg0 : i32, i32
  }
}

module attributes {stable_mosaic.version = 11 : i64} {
  func.func @_disc_kernel(%arg0: i32, %arg1: memref<256x64xf32, #tpu.memory_space<vmem>>, %arg2: memref<128x64xbf16, #tpu.memory_space<vmem>>, %arg3: memref<128x128xbf16, #tpu.memory_space<vmem>>, %arg4: memref<128x3xf32, #tpu.memory_space<vmem>>, %arg5: memref<1xf32, #tpu.memory_space<smem>>, %arg6: memref<1x256xf32, #tpu.memory_space<vmem>>) attributes {dimension_semantics = [#tpu.dimension_semantics<parallel>], iteration_bounds = array<i64: 3>, scalar_prefetch = 0 : i64, scratch_operands = 0 : i64, tpu.core_type = #tpu.core_type<tc>, window_params = [{transform_indices = @transform_0, window_bounds = array<i64: 256, 64>}, {pipeline_mode = #tpu.pipeline_mode<synchronous>, transform_indices = @transform_1, window_bounds = array<i64: 128, 64>}, {pipeline_mode = #tpu.pipeline_mode<synchronous>, transform_indices = @transform_2, window_bounds = array<i64: 128, 128>}, {pipeline_mode = #tpu.pipeline_mode<synchronous>, transform_indices = @transform_3, window_bounds = array<i64: 128, 3>}, {transform_indices = @transform_4, window_bounds = array<i64: 1>}, {transform_indices = @transform_5, window_bounds = array<i64: 1, 256>}]} {
    %c0 = arith.constant 0 : index
    %c0_0 = arith.constant 0 : index
    %0 = vector.load %arg1[%c0, %c0_0] : memref<256x64xf32, #tpu.memory_space<vmem>>, vector<256x64xf32>
    %1 = arith.truncf %0 : vector<256x64xf32> to vector<256x64xbf16>
    %c0_1 = arith.constant 0 : index
    %c0_2 = arith.constant 0 : index
    %2 = vector.load %arg4[%c0_1, %c0_2] : memref<128x3xf32, #tpu.memory_space<vmem>>, vector<128x1xf32>
    %c0_3 = arith.constant 0 : index
    %c1 = arith.constant 1 : index
    %3 = vector.load %arg4[%c0_3, %c1] : memref<128x3xf32, #tpu.memory_space<vmem>>, vector<128x1xf32>
    %c0_4 = arith.constant 0 : index
    %c2 = arith.constant 2 : index
    %4 = vector.load %arg4[%c0_4, %c2] : memref<128x3xf32, #tpu.memory_space<vmem>>, vector<128x1xf32>
    %c0_5 = arith.constant 0 : index
    %c0_6 = arith.constant 0 : index
    %5 = vector.load %arg2[%c0_5, %c0_6] : memref<128x64xbf16, #tpu.memory_space<vmem>>, vector<128x64xbf16>
    %cst = arith.constant dense<0.000000e+00> : vector<128x256xf32>
    %6 = tpu.matmul %5, %1, %cst {dimension_numbers = #tpu.dot_dimension_numbers<[1], [1], [0], [0], [0, 0, 1, 0], [], []>} : vector<128x64xbf16>, vector<256x64xbf16>, vector<128x256xf32> -> vector<128x256xf32>
    %7 = arith.truncf %6 : vector<128x256xf32> to vector<128x256xbf16>
    %8 = arith.truncf %2 : vector<128x1xf32> to vector<128x1xbf16>
    %9 = vector.broadcast %8 : vector<128x1xbf16> to vector<128x256xbf16>
    %10 = arith.addf %7, %9 : vector<128x256xbf16>
    %cst_7 = arith.constant 2.001950e-01 : bf16
    %11 = vector.broadcast %cst_7 : bf16 to vector<128x256xbf16>
    %12 = arith.mulf %11, %10 : vector<128x256xbf16>
    %13 = arith.maximumf %10, %12 : vector<128x256xbf16>
    %c0_8 = arith.constant 0 : index
    %c0_9 = arith.constant 0 : index
    %14 = vector.load %arg3[%c0_8, %c0_9] : memref<128x128xbf16, #tpu.memory_space<vmem>>, vector<128x128xbf16>
    %cst_10 = arith.constant dense<0.000000e+00> : vector<128x256xf32>
    %15 = tpu.matmul %14, %13, %cst_10 {dimension_numbers = #tpu.dot_dimension_numbers<[1], [0], [0], [1], [0, 0, 1, 1], [], []>} : vector<128x128xbf16>, vector<128x256xbf16>, vector<128x256xf32> -> vector<128x256xf32>
    %16 = vector.broadcast %3 : vector<128x1xf32> to vector<128x256xf32>
    %17 = arith.addf %15, %16 : vector<128x256xf32>
    %cst_11 = arith.constant 2.000000e-01 : f32
    %18 = vector.broadcast %cst_11 : f32 to vector<128x256xf32>
    %19 = arith.mulf %18, %17 : vector<128x256xf32>
    %20 = arith.maximumf %17, %19 : vector<128x256xf32>
    %21 = vector.broadcast %4 : vector<128x1xf32> to vector<128x256xf32>
    %22 = arith.mulf %20, %21 : vector<128x256xf32>
    %cst_12 = arith.constant dense<0.000000e+00> : vector<256xf32>
    %23 = vector.multi_reduction <add>, %22, %cst_12 [0] : vector<128x256xf32> to vector<256xf32>
    %24 = vector.shape_cast %23 : vector<256xf32> to vector<1x256xf32>
    %c0_13 = arith.constant 0 : index
    %25 = memref.load %arg5[%c0_13] : memref<1xf32, #tpu.memory_space<smem>>
    %26 = vector.broadcast %25 : f32 to vector<1x256xf32>
    %27 = arith.addf %24, %26 : vector<1x256xf32>
    %c0_14 = arith.constant 0 : index
    %c0_15 = arith.constant 0 : index
    %28 = vector.load %arg6[%c0_14, %c0_15] : memref<1x256xf32, #tpu.memory_space<vmem>>, vector<1x256xf32>
    tpu.vector_store %arg6[%c0_14, %c0_15], %27 {strides = array<i32>} : memref<1x256xf32, #tpu.memory_space<vmem>>, vector<1x256xf32>,
    return
  }
  func.func @transform_0(%arg0: i32) -> (i32, i32) {
    %c0_i32 = arith.constant 0 : i32
    %c0_i32_0 = arith.constant 0 : i32
    return %arg0, %c0_i32 : i32, i32
  }
  func.func @transform_1(%arg0: i32) -> (i32, i32) {
    %c0_i32 = arith.constant 0 : i32
    %c0_i32_0 = arith.constant 0 : i32
    %c0_i32_1 = arith.constant 0 : i32
    return %c0_i32, %c0_i32_0 : i32, i32
  }
  func.func @transform_2(%arg0: i32) -> (i32, i32) {
    %c0_i32 = arith.constant 0 : i32
    %c0_i32_0 = arith.constant 0 : i32
    %c0_i32_1 = arith.constant 0 : i32
    return %c0_i32, %c0_i32_0 : i32, i32
  }
  func.func @transform_3(%arg0: i32) -> (i32, i32) {
    %c0_i32 = arith.constant 0 : i32
    %c0_i32_0 = arith.constant 0 : i32
    %c0_i32_1 = arith.constant 0 : i32
    return %c0_i32, %c0_i32_0 : i32, i32
  }
  func.func @transform_4(%arg0: i32) -> i32 {
    %c0_i32 = arith.constant 0 : i32
    %c0_i32_0 = arith.constant 0 : i32
    return %c0_i32 : i32
  }
  func.func @transform_5(%arg0: i32) -> (i32, i32) {
    %c0_i32 = arith.constant 0 : i32
    %c0_i32_0 = arith.constant 0 : i32
    return %c0_i32, %arg0 : i32, i32
  }
}

</mosaic_0001>

<bundles_post_ra>
// kernel: tpu_custom_call.1
= control target key start
LH: loop header
LB: loop body
LE: loop exit
PB: predicated region body
PF: predicated region fallthrough
CT: control target
= control target key end

     0   :  { %s1942_s0 = inlined_call_operand.vmem [shape: f32[768,64], index: 0, kind: input, shape index: {}]   ;;  %s1943_s1 = inlined_call_operand.vmem [shape: bf16[128,64], index: 1, kind: input, shape index: {}]   ;;  %s1944_s2 = inlined_call_operand.vmem [shape: bf16[128,128], index: 2, kind: input, shape index: {}]   ;;  %s1945_s3 = inlined_call_operand.vmem [shape: f32[128,3], index: 3, kind: input, shape index: {}]   ;;  %s1946_s4 = inlined_call_operand.<no memory space> [shape: f32[1], index: 4, kind: input, shape index: {}]   ;;  %s1947_s5 = inlined_call_operand.hbm [shape: f32[1,768], index: 5, kind: output, shape index: {}]  }
   0x1   :  { %10 = sst [smem:[#allocation2]] %s1946_s4 }
   0x2   :  { %11 = vsyncpa [#allocation4], 0 }
   0x3   :  { %13 = vsyncpa [#allocation4 + $0x1], 0  ;;  %s1451_s20 = smov 0   ;;  %s1453_s21 = smov 0  }
   0x4   :  { %s1455_s22 = smov 0   ;;  %s1457_s23 = smov 0  }
   0x5 LB: > { %s1206_s4 = sadd.s32 4294967295, %s1411_s23   ;;  %s1207_s24 = sadd.s32 4294967294, %s1411_s23   ;;  %s1411_s23 = sphi %s1457_s23, %s1953_s23   ;;  %s1407_s22 = sphi %s1455_s22, %s1952_s22   ;;  %s1403_s21 = sphi %s1453_s21, %s1951_s21   ;;  %s1399_s20 = sphi %s1451_s20, %s1950_s20  }
   0x6   : > { %s1474_s25 = sadd.s32 1, %s1411_s23   ;;  %s136_s26 = sadd.s32 1, %s1407_s22 }
   0x7   : > { %s133_s27 = ssub.s32 %s1411_s23, %s1474_s25  ;;  %p146_p0 = scmp.ne.s32.totalorder %s1407_s22, %s1403_s21 }
   0x8   : > { %p134_p1 = scmp.eq.s32.totalorder %s133_s27, 0  ;;  %p147_p2 = scmp.eq.s32.totalorder %s1206_s4, 2 }
   0x9   : > { %p152_p3 = scmp.ne.s32.totalorder %s1403_s21, %s1399_s20  ;;  %p153_p4 = scmp.eq.s32.totalorder %s1207_s24, 2 }
   0xa   : > { %s1484_s28 = scalar_select %p134_p1, %s1407_s22, %s136_s26  }
   0xb   : > { %p1486_p5 = por %p147_p2, %p146_p0  ;;  %p1490_p6 = por %p153_p4, %p152_p3 }
   0xc   : > { %p1210_p7 = scmp.ge.s32.totalorder %s1411_s23, 1  ;;  %p192_p8 = scmp.lt.s32.totalorder %s1411_s23, 4 }
   0xe   : > { %p193_p9 = pnand %p1210_p7, %p192_p8 }
   0xf   : > { %s1496_s6 = sshll.u32 (!%p193_p9), %s1206_s4, 5  ;;  %s1417_s19 = smov (!%p193_p9), [#allocation3]  }
  0x10   : > { %196 = sbr.rel (%p193_p9) target bundleno = 686 (0x2ae), region = 40  ;;  %p221_p10 = scmp.lt.s32.totalorder (!%p193_p9), %s1496_s6, 95 }
  0x11   : > { %s1146_s17 = scalar_lea.hbm (!%p193_p9), %s1947_s5, %s1496_s6  ;;  %s1355_s4 = sshll.u32 (!%p193_p9), %s1417_s19, 4  ;;  %s1356_s4 = int_to_ptr.vmem [resolvable:$false] %s1355_s4 }
  0x12   : > { %s1357_s24 = scalar_lea.vmem (!%p193_p9), %s1356_s4, 64 }
  0x15   : > { %v1502_v0 = vld [vmem:[%s1943_s1] sm:$0xff]   ;;  %vm349_vm0 = vcmask 523264   ;;  %s222_s9 = scalar_select %p221_p10, %s1496_s6, 95  ;;  %v1413_v1 = vmov 0   ;;  %v1534_v21 = vld [vmem:[%s1945_s3 + $0x50] sm:$0xff]  ;;  %v1539_v22 = vld [vmem:[%s1945_s3 + $0x58] sm:$0xff] }
  0x16   : > { %1260 = vmatprep.mubr.msk.bf16.mxu0 %vm349_vm0, %v1502_v0  ;;  %1328 = vset.pattern.permute.xlu1 %v1413_v1  ;;  %v1544_v23 = vld [vmem:[%s1945_s3 + $0x40] sm:$0xff]  ;;  %v556_v25 = vpack.c.bf16 %v1539_v22, %v1534_v21  ;;  %v1551_v26 = vld [vmem:[%s1945_s3 + $0x48] sm:$0xff]  ;;  %v1556_v27 = vld [vmem:[%s1945_s3 + $0x70] sm:$0xff] }
  0x17   : > { %s1213_s10 = sshll.u32 %s222_s9, 3  ;;  %1327 = vset.pattern.permute.xlu0 %v1413_v1  ;;  %823 = vmatprep.mubr.bf16.mxu1 %v1413_v1  ;;  %v1561_v28 = vld [vmem:[%s1945_s3 + $0x78] sm:$0xff]  ;;  %v1569_v30 = vld [vmem:[%s1945_s3 + $0x60] sm:$0xff]  ;;  %v555_v33 = vpack.c.bf16 %v1551_v26, %v1544_v23  ;;  %v1578_v34 = vld [vmem:[%s1945_s3 + $0x68] sm:$0xff]  ;;  %s1106_s9 = sld [smem:[#allocation2]] }
  0x18   : > { %s1512_s13 = scalar_lea.vmem %s1942_s0, %s1213_s10  ;;  %v558_v29 = vpack.c.bf16 %v1561_v28, %v1556_v27  ;;  %586 = vperm.xlu1 %1328, %v556_v25   ;;  %v1583_v35 = vld [vmem:[%s1945_s3 + $0x20] sm:$0xff]  ;;  %v1588_v36 = vld [vmem:[%s1945_s3 + $0x28] sm:$0xff]  ;;  %v557_v37 = vpack.c.bf16 %v1578_v34, %v1569_v30  ;;  %v1595_v38 = vld [vmem:[%s1945_s3 + $0x30] sm:$0xff]  ;;  %s217_s10 = sand.u32 1, %s1403_s21  }
  0x19   : > { %v259_v2 = vld [vmem:[%s1512_s13 + $0xf0] sm:$0xff]  ;;  %v260_v3 = vld [vmem:[%s1512_s13 + $0xf8] sm:$0xff]  ;;  %v257_v7 = vld [vmem:[%s1512_s13 + $0xe0] sm:$0xff]  ;;  %v553_v46 = vpack.c.bf16 %v1588_v36, %v1583_v35  ;;  %s1211_s11 = sshll.u32 %s217_s10, 1 }
  0x1a   : > { %v243_v4 = vld [vmem:[%s1512_s13 + $0x70] sm:$0xff]  ;;  %v276_v5 = vpack.c.bf16 %v260_v3, %v259_v2  ;;  %v244_v6 = vld [vmem:[%s1512_s13 + $0x78] sm:$0xff]  ;;  %v258_v8 = vld [vmem:[%s1512_s13 + $0xe8] sm:$0xff]  ;;  %596 = vperm.xlu0 %1327, %v558_v29   ;;  %s219_s12 = scalar_lea.vmem [#allocation3], %s1211_s11 }
  0x1b   : > { %v268_v9 = vpack.c.bf16 %v244_v6, %v243_v4  ;;  %v275_v10 = vpack.c.bf16 %v258_v8, %v257_v7  ;;  %v241_v11 = vld [vmem:[%s1512_s13 + $0x60] sm:$0xff]  ;;  %v242_v12 = vld [vmem:[%s1512_s13 + $0x68] sm:$0xff]  ;;  %v255_v15 = vld [vmem:[%s1512_s13 + $0xd0] sm:$0xff]  ;;  %s1148_s14 = sshll.u32 %s219_s12, 4  ;;  %s1149_s14 = int_to_ptr.vmem [resolvable:$true] %s1148_s14 }
  0x1c   : > { %1276 = vmatprep.subr.msk.bf16.mxu0 %vm349_vm0, %v276_v5  ;;  %v267_v14 = vpack.c.bf16 %v242_v12, %v241_v11  ;;  %v256_v16 = vld [vmem:[%s1512_s13 + $0xd8] sm:$0xff]  ;;  %v239_v19 = vld [vmem:[%s1512_s13 + $0x50] sm:$0xff]  ;;  %v253_v31 = vld [vmem:[%s1512_s13 + $0xc0] sm:$0xff]  ;;  %581 = vperm.xlu1 %1328, %v555_v33   ;;  %s1351_s18 = scalar_lea.vmem %s1149_s14, 32  ;;  %p1358_p0 = scmp.lt.s32.totalorder %s1149_s14, %s1356_s4 }
  0x1d   : > { %v396_v13 = vsel %vm349_vm0, %v268_v9, 0  ;;  %v274_v18 = vpack.c.bf16 %v256_v16, %v255_v15  ;;  %v240_v20 = vld [vmem:[%s1512_s13 + $0x58] sm:$0xff]  ;;  %v254_v32 = vld [vmem:[%s1512_s13 + $0xc8] sm:$0xff]  ;;  %v237_v40 = vld [vmem:[%s1512_s13 + $0x40] sm:$0xff]  ;;  %p1352_p11 = scmp.ne.s32.totalorder %s1149_s14, %s1351_s18  ;;  %p1359_p1 = scmp.lt.s32.totalorder %s1357_s24, %s1351_s18 }
  0x1e   : > { %1245 = vmatpush3.bf16.xpose.msra.mxu0 %v396_v13  ;;  %v393_v17 = vsel %vm349_vm0, %v267_v14, 0  ;;  %v266_v24 = vpack.c.bf16 %v240_v20, %v239_v19  ;;  %v238_v41 = vld [vmem:[%s1512_s13 + $0x48] sm:$0xff]  ;;  %v1603_v42 = vld [vmem:[%s1945_s3 + $0x38] sm:$0xff]  ;;  %v273_v43 = vpack.c.bf16 %v254_v32, %v253_v31  ;;  %v1608_v44 = vld [vmem:[%s1945_s3] sm:$0xff]  ;;  %591 = vperm.xlu0 %1327, %v557_v37   ;;  %v1414_v37 = vmov 1  }
  0x1f   : > { %1277 = vmatprep.subr.msk.bf16.mxu0 %vm349_vm0, %v275_v10  ;;  %v1613_v45 = vld [vmem:[%s1945_s3 + $0x8] sm:$0xff]  ;;  %v1620_v47 = vld [vmem:[%s1945_s3 + $0x10] sm:$0xff]  ;;  %v1625_v48 = vld [vmem:[%s1945_s3 + $0x18] sm:$0xff]  ;;  %v554_v49 = vpack.c.bf16 %v1603_v42, %v1595_v38  ;;  %v265_v50 = vpack.c.bf16 %v238_v41, %v237_v40  ;;  %p1353_p12 = pnand %p1352_p11, %p1486_p5  ;;  %p1360_p2 = por %p1359_p1, %p1358_p0 }
  0x20   : > { %v390_v39 = vsel %vm349_vm0, %v266_v24, 0  ;;  %v251_v51 = vld [vmem:[%s1512_s13 + $0xb0] sm:$0xff]  ;;  %v252_v52 = vld [vmem:[%s1512_s13 + $0xb8] sm:$0xff]  ;;  %571 = vperm.xlu1 %1328, %v553_v46   ;;  %v551_v53 = vpack.c.bf16 %v1613_v45, %v1608_v44  ;;  %v552_v54 = vpack.c.bf16 %v1625_v48, %v1620_v47  ;;  %v249_v60 = vld [vmem:[%s1512_s13 + $0xa0] sm:$0xff] }
  0x21   : > { %v387_v55 = vsel %vm349_vm0, %v265_v50, 0  ;;  %v272_v56 = vpack.c.bf16 %v252_v52, %v251_v51  ;;  %v235_v57 = vld [vmem:[%s1512_s13 + $0x30] sm:$0xff]  ;;  %v236_v58 = vld [vmem:[%s1512_s13 + $0x38] sm:$0xff]  ;;  %v250_v61 = vld [vmem:[%s1512_s13 + $0xa8] sm:$0xff]  ;;  %v1415_v50 = vmov 2   ;;  %p1354_p13 = pneg %p1353_p12 }
  0x22   : > { %576 = vperm.xlu0 %1327, %v554_v49   ;;  %v264_v59 = vpack.c.bf16 %v236_v58, %v235_v57  ;;  %v271_v63 = vpack.c.bf16 %v250_v61, %v249_v60  ;;  %v233_v2 = vld [vmem:[%s1512_s13 + $0x20] sm:$0xff]  ;;  %v234_v3 = vld [vmem:[%s1512_s13 + $0x28] sm:$0xff]  ;;  %v247_v5 = vld [vmem:[%s1512_s13 + $0x90] sm:$0xff] }
  0x23   : > { %v263_v4 = vpack.c.bf16 %v234_v3, %v233_v2  ;;  %v248_v6 = vld [vmem:[%s1512_s13 + $0x98] sm:$0xff]  ;;  %v231_v9 = vld [vmem:[%s1512_s13 + $0x10] sm:$0xff]  ;;  %v245_v12 = vld [vmem:[%s1512_s13 + $0x80] sm:$0xff]  ;;  %p1361_p3 = pnand %p1360_p2, %p1354_p13 }
  0x24   : > { %561 = vperm.xlu1 %1328, %v551_v53   ;;  %v384_v62 = vsel %vm349_vm0, %v264_v59, 0  ;;  %v270_v8 = vpack.c.bf16 %v248_v6, %v247_v5  ;;  %v232_v10 = vld [vmem:[%s1512_s13 + $0x18] sm:$0xff]  ;;  %v246_v13 = vld [vmem:[%s1512_s13 + $0x88] sm:$0xff]  ;;  %v229_v16 = vld [vmem:[%s1512_s13] sm:$0xff] }
  0x25   : > { %v381_v7 = vsel %vm349_vm0, %v263_v4, 0  ;;  %v262_v11 = vpack.c.bf16 %v232_v10, %v231_v9  ;;  %v269_v15 = vpack.c.bf16 %v246_v13, %v245_v12  ;;  %v1336_v20 = vld [vmem:[%s1943_s1 + $0x8] sm:$0xff]   ;;  %v1337_v24 = vld [vmem:[%s1943_s1 + $0x10] sm:$0xff]   ;;  %v1338_v25 = vld [vmem:[%s1943_s1 + $0x18] sm:$0xff]  }
  0x26   : > { %1247 = vmatpush3.bf16.xpose.msra.mxu0 %v393_v17  ;;  %566 = vperm.xlu0 %1327, %v552_v54   ;;  %v230_v17 = vld [vmem:[%s1512_s13 + $0x8] sm:$0xff]  ;;  %v1341_v31 = vld [vmem:[%s1943_s1 + $0x30] sm:$0xff]   ;;  %v1342_v32 = vld [vmem:[%s1943_s1 + $0x38] sm:$0xff]   ;;  %s1134_s13 = scalar_lea.sflag [#allocation4], %s217_s10 }
  0x27   : > { %1278 = vmatprep.subr.msk.bf16.mxu0 %vm349_vm0, %v274_v18  ;;  %v378_v14 = vsel %vm349_vm0, %v262_v11, 0  ;;  %v261_v18 = vpack.c.bf16 %v230_v17, %v229_v16  ;;  %v1340_v29 = vld [vmem:[%s1943_s1 + $0x28] sm:$0xff]  }
  0x28   : > { %1330 = vset.pattern.permute.xlu1 %v1414_v37 }
  0x29   : > { %v375_v19 = vsel %vm349_vm0, %v261_v18, 0  ;;  %670 = vperm.xlu1 %1330, %v1613_v45  }
  0x2a   : > { %1329 = vset.pattern.permute.xlu0 %v1414_v37 }
  0x2b   : > { %665 = vperm.xlu0 %1329, %v1608_v44  }
  0x2d   : > { %675 = vperm.xlu1 %1330, %v1620_v47  }
  0x2e   : > { %1249 = vmatpush3.bf16.xpose.msra.mxu0 %v390_v39 }
  0x2f   : > { %1279 = vmatprep.subr.msk.bf16.mxu0 %vm349_vm0, %v273_v43  ;;  %680 = vperm.xlu0 %1329, %v1625_v48  }
  0x31   : > { %685 = vperm.xlu1 %1330, %v1583_v35  }
  0x33   : > { %1331 = vset.pattern.permute.xlu0 %v1415_v50 }
  0x34   : > { %969 = vperm.xlu0 %1331, %v1608_v44  }
  0x35   : > { %1332 = vset.pattern.permute.xlu1 %v1415_v50 }
  0x36   : > { %1251 = vmatpush3.bf16.xpose.msra.mxu0 %v387_v55  ;;  %973 = vperm.xlu1 %1332, %v1613_v45  }
  0x37   : > { %1280 = vmatprep.subr.msk.bf16.mxu0 %vm349_vm0, %v272_v56 }
  0x38   : > { %977 = vperm.xlu0 %1331, %v1620_v47  }
  0x3a   : > { %1333 = vset.pattern.permute.xlu1 %v1414_v37 }
  0x3b   : > { %690 = vperm.xlu1 %1333, %v1588_v36  }
  0x3c   : > { %981 = vperm.xlu0 %1331, %v1625_v48  }
  0x3e   : > { %1253 = vmatpush3.bf16.xpose.msra.mxu0 %v384_v62 }
  0x3f   : > { %1281 = vmatprep.subr.msk.bf16.mxu0 %vm349_vm0, %v271_v63  ;;  %695 = vperm.xlu1 %1333, %v1595_v38  }
  0x40   : > { %985 = vperm.xlu0 %1331, %v1583_v35  }
  0x43   : > { %700 = vperm.xlu1 %1333, %v1603_v42  }
  0x44   : > { %989 = vperm.xlu0 %1331, %v1588_v36  }
  0x46   : > { %1255 = vmatpush3.bf16.xpose.msra.mxu0 %v381_v7 }
  0x47   : > { %1282 = vmatprep.subr.msk.bf16.mxu0 %vm349_vm0, %v270_v8  ;;  %705 = vperm.xlu1 %1333, %v1544_v23  }
  0x48   : > { %993 = vperm.xlu0 %1331, %v1595_v38  }
  0x4b   : > { %710 = vperm.xlu1 %1333, %v1551_v26  }
  0x4c   : > { %997 = vperm.xlu0 %1331, %v1603_v42  }
  0x4e   : > { %1257 = vmatpush3.bf16.xpose.msra.mxu0 %v378_v14 }
  0x4f   : > { %1283 = vmatprep.subr.msk.bf16.mxu0 %vm349_vm0, %v269_v15  ;;  %715 = vperm.xlu1 %1333, %v1534_v21  }
  0x50   : > { %1001 = vperm.xlu0 %1331, %v1544_v23  }
  0x53   : > { %720 = vperm.xlu1 %1333, %v1539_v22  }
  0x54   : > { %1005 = vperm.xlu0 %1331, %v1551_v26  }
  0x56   : > { %1259 = vmatpush3.bf16.xpose.msra.mxu0 %v375_v19 }
  0x57   : > { %725 = vperm.xlu1 %1333, %v1569_v30  }
  0x58   : > { %1009 = vperm.xlu0 %1331, %v1534_v21  }
  0x5b   : > { %730 = vperm.xlu1 %1333, %v1578_v34  }
  0x5c   : > { %1013 = vperm.xlu0 %1331, %v1539_v22  }
  0x5d   : > { %1261 = vmatmul.mubr.msk.bf16.vlgmr.msra.gmra.mxu0 %vm349_vm0, %v1502_v0  ;;  %v1339_v0 = vld [vmem:[%s1943_s1 + $0x20] sm:$0xff]  }
  0x5e   : > { %1262 = vmatprep.mubr.msk.bf16.mxu0 %vm349_vm0, %v1336_v20 }
  0x5f   : > { %735 = vperm.xlu1 %1333, %v1556_v27  }
  0x60   : > { %1017 = vperm.xlu0 %1331, %v1569_v30  }
  0x63   : > { %740 = vperm.xlu1 %1333, %v1561_v28  }
  0x64   : > { %1025 = vperm.xlu0 %1331, %v1556_v27  }
  0x65   : > { %1263 = vmatmul.mubr.msk.bf16.gmra.mxu0 %vm349_vm0, %v1336_v20 }
  0x66   : > { %1264 = vmatprep.mubr.msk.bf16.mxu0 %vm349_vm0, %v1337_v24 }
  0x67   : > { %1334 = vset.pattern.permute.xlu1 %v1415_v50 }
  0x68   : > { %1021 = vperm.xlu1 %1334, %v1578_v34  }
  0x6c   : > { %1029 = vperm.xlu1 %1334, %v1561_v28  }
  0x6d   : > { %1265 = vmatmul.mubr.msk.bf16.gmra.mxu0 %vm349_vm0, %v1337_v24 }
  0x6e   : > { %1266 = vmatprep.mubr.msk.bf16.mxu0 %vm349_vm0, %v1338_v25 }
  0x75   : > { %1267 = vmatmul.mubr.msk.bf16.gmra.mxu0 %vm349_vm0, %v1338_v25 }
  0x76   : > { %1268 = vmatprep.mubr.msk.bf16.mxu0 %vm349_vm0, %v1339_v0 }
  0x7d   : > { %1269 = vmatmul.mubr.msk.bf16.gmra.mxu0 %vm349_vm0, %v1339_v0 }
  0x7e   : > { %1270 = vmatprep.mubr.msk.bf16.mxu0 %vm349_vm0, %v1340_v29 }
  0x85   : > { %1271 = vmatmul.mubr.msk.bf16.gmra.mxu0 %vm349_vm0, %v1340_v29 }
  0x86   : > { %1272 = vmatprep.mubr.msk.bf16.mxu0 %vm349_vm0, %v1341_v31 }
  0x8d   : > { %1273 = vmatmul.mubr.msk.bf16.gmra.mxu0 %vm349_vm0, %v1341_v31 }
  0x8e   : > { %1274 = vmatprep.mubr.msk.bf16.mxu0 %vm349_vm0, %v1342_v32 }
  0x93   : > { %v587_v30 = vpop.permute.xlu1 %586 }
  0x95   : > { %1275 = vmatmul.mubr.msk.bf16.gmra.mxu0 %vm349_vm0, %v1342_v32  ;;  %v597_v26 = vpop.permute.xlu0 %596 }
  0x97   : > { %v582_v0 = vpop.permute.xlu1 %581 }
  0x99   : > { %v592_v9 = vpop.permute.xlu0 %591 }
 0x11d   : > { %v1696_v33 = vpop.f32.mrf.mxu0 }
 0x11f   : > { %v1700_v39 = vpop.f32.mrf.mxu0 }
 0x121   : > { %v1702_v40 = vpop.f32.mrf.mxu0 }
 0x122   : > { %v535_v41 = vpack.c.bf16 %v1702_v40, %v1696_v33  ;;  %v1344_v33 = vld [vmem:[%s1944_s2 + $0x8] sm:$0xff]   ;;  %v1345_v40 = vld [vmem:[%s1944_s2 + $0x10] sm:$0xff]  }
 0x123   : > { %v1708_v43 = vpop.f32.mrf.mxu0 }
 0x124   : > { %v536_v46 = vpack.c.bf16 %v1708_v43, %v1700_v39  ;;  %v1343_v43 = vld [vmem:[%s1944_s2] sm:$0xff]  }
 0x125   : > { %v1712_v49 = vpop.f32.mrf.mxu0 }
 0x127   : > { %v1716_v51 = vpop.f32.mrf.mxu0 }
 0x129   : > { %v1719_v52 = vpop.f32.mrf.mxu0 }
 0x12a   : > { %v537_v53 = vpack.c.bf16 %v1719_v52, %v1712_v49 }
 0x12b   : > { %v1724_v54 = vpop.f32.mrf.mxu0 }
 0x12c   : > { %v538_v55 = vpack.c.bf16 %v1724_v54, %v1716_v51 }
 0x12d   : > { %v1730_v56 = vpop.f32.mrf.mxu0 }
 0x12f   : > { %v1732_v57 = vpop.f32.mrf.mxu0 }
 0x131   : > { %v1736_v44 = vpop.f32.mrf.mxu0 }
 0x133   : > { %v1738_v58 = vpop.f32.mrf.mxu0 }
 0x135   : > { %v1742_v45 = vpop.f32.mrf.mxu0 }
 0x137   : > { %v1744_v47 = vpop.f32.mrf.mxu0 }
 0x139   : > { %v1748_v48 = vpop.f32.mrf.mxu0 }
 0x13a   : > { %v541_v28 = vpack.c.bf16 %v1748_v48, %v1742_v45 }
 0x13b   : > { %v1750_v59 = vpop.f32.mrf.mxu0 }
 0x13c   : > { %v542_v34 = vpack.c.bf16 %v1750_v59, %v1744_v47  ;;  %v572_v47 = vpop.permute.xlu1 %571  ;;  %v539_v59 = vpack.c.bf16 %v1736_v44, %v1730_v56 }
 0x13d   : > { %v1754_v60 = vpop.f32.mrf.mxu0 }
 0x13f   : > { %v498_v35 = vpop.f32.mrf.mxu0 }
 0x140   : > { %v562_v56 = vpop.permute.xlu1 %561 }
 0x141   : > { %v1758_v61 = vpop.f32.mrf.mxu0  ;;  %v599_v51 = vadd.bf16 %v562_v56, %v535_v41  ;;  %v1346_v41 = vld [vmem:[%s1944_s2 + $0x18] sm:$0xff]  }
 0x142   : > { %v543_v29 = vpack.c.bf16 %v1758_v61, %v1754_v60  ;;  %v540_v60 = vpack.c.bf16 %v1738_v58, %v1732_v57 }
 0x143   : > { %v502_v36 = vpop.f32.mrf.mxu0  ;;  %v615_v49 = vmul.bf16 1045249613, %v599_v51 }
 0x144   : > { %v544_v18 = vpack.c.bf16 %v502_v36, %v498_v35  ;;  %v577_v36 = vpop.permute.xlu0 %576 }
 0x145   : > { %v506_v62 = vpop.f32.mrf.mxu0  ;;  %v606_v61 = vadd.bf16 %v577_v36, %v542_v34  ;;  %v631_v39 = vmax.bf16 %v615_v49, %v599_v51 }
 0x146   : > { %v608_v50 = vadd.bf16 %v582_v0, %v544_v18 }
 0x147   : > { %v508_v63 = vpop.f32.mrf.mxu0  ;;  %v622_v45 = vmul.bf16 1045249613, %v606_v61 }
 0x149   : > { %v510_v38 = vpop.f32.mrf.mxu0 }
 0x14a   : > { %v545_v16 = vpack.c.bf16 %v510_v38, %v506_v62 }
 0x14b   : > { %v512_v2 = vpop.f32.mrf.mxu0 }
 0x14c   : > { %v546_v11 = vpack.c.bf16 %v512_v2, %v508_v63  ;;  %v609_v31 = vadd.bf16 %v587_v30, %v545_v16  ;;  %v607_v63 = vadd.bf16 %v582_v0, %v543_v29  ;;  %v1349_v16 = vld [vmem:[%s1944_s2 + $0x30] sm:$0xff]  }
 0x14d   : > { %v516_v42 = vpop.f32.mrf.mxu0 }
 0x14e   : > { %v610_v19 = vadd.bf16 %v587_v30, %v546_v11  ;;  %v625_v38 = vmul.bf16 1045249613, %v609_v31  ;;  %v600_v11 = vadd.bf16 %v562_v56, %v536_v46  ;;  %v1347_v46 = vld [vmem:[%s1944_s2 + $0x20] sm:$0xff]  }
 0x14f   : > { %v518_v3 = vpop.f32.mrf.mxu0 }
 0x150   : > { %v626_v62 = vmul.bf16 1045249613, %v610_v19 }
 0x151   : > { %v520_v23 = vpop.f32.mrf.mxu0 }
 0x152   : > { %v547_v22 = vpack.c.bf16 %v520_v23, %v516_v42  ;;  %v624_v42 = vmul.bf16 1045249613, %v608_v50  ;;  %v605_v23 = vadd.bf16 %v577_v36, %v541_v28 }
 0x153   : > { %v522_v4 = vpop.f32.mrf.mxu0 }
 0x154   : > { %v548_v21 = vpack.c.bf16 %v522_v4, %v518_v3  ;;  %v611_v27 = vadd.bf16 %v592_v9, %v547_v22  ;;  %v642_v3 = vmax.bf16 %v626_v62, %v610_v19  ;;  %v623_v4 = vmul.bf16 1045249613, %v607_v63 }
 0x155   : > { %v526_v5 = vpop.f32.mrf.mxu0  ;;  %v640_v48 = vmax.bf16 %v624_v42, %v608_v50  ;;  %v621_v57 = vmul.bf16 1045249613, %v605_v23 }
 0x156   : > { %v612_v12 = vadd.bf16 %v592_v9, %v548_v21  ;;  %v627_v32 = vmul.bf16 1045249613, %v611_v27  ;;  %v603_v21 = vadd.bf16 %v572_v47, %v539_v59  ;;  %v639_v58 = vmax.bf16 %v623_v4, %v607_v63 }
 0x157   : > { %v528_v6 = vpop.f32.mrf.mxu0  ;;  %v638_v9 = vmax.bf16 %v622_v45, %v606_v61 }
 0x158   : > { %v628_v20 = vmul.bf16 1045249613, %v612_v12  ;;  %v643_v2 = vmax.bf16 %v627_v32, %v611_v27  ;;  %v619_v22 = vmul.bf16 1045249613, %v603_v21  ;;  %v1350_v27 = vld [vmem:[%s1944_s2 + $0x38] sm:$0xff]  }
 0x159   : > { %v530_v7 = vpop.f32.mrf.mxu0 }
 0x15a   : > { %v549_v8 = vpack.c.bf16 %v530_v7, %v526_v5  ;;  %v644_v35 = vmax.bf16 %v628_v20, %v612_v12  ;;  %v604_v5 = vadd.bf16 %v572_v47, %v540_v60 }
 0x15b   : > { %v532_v10 = vpop.f32.mrf.mxu0 }
 0x15c   : > { %v613_v13 = vadd.bf16 %v597_v26, %v549_v8  ;;  %v550_v14 = vpack.c.bf16 %v532_v10, %v528_v6  ;;  %v567_v6 = vpop.permute.xlu0 %566  ;;  %v620_v8 = vmul.bf16 1045249613, %v604_v5  ;;  %v637_v10 = vmax.bf16 %v621_v57, %v605_v23 }
 0x15d   : > { %v602_v7 = vadd.bf16 %v567_v6, %v538_v55  ;;  %v601_v44 = vadd.bf16 %v567_v6, %v537_v53  ;;  %v635_v55 = vmax.bf16 %v619_v22, %v603_v21 }
 0x15e   : > { %v614_v15 = vadd.bf16 %v597_v26, %v550_v14  ;;  %v629_v17 = vmul.bf16 1045249613, %v613_v13  ;;  %v641_v26 = vmax.bf16 %v625_v38, %v609_v31  ;;  %v616_v14 = vmul.bf16 1045249613, %v600_v11 }
 0x15f   : > { %v618_v12 = vmul.bf16 1045249613, %v602_v7  ;;  %v617_v54 = vmul.bf16 1045249613, %v601_v44 }
 0x160   : > { %v630_v24 = vmul.bf16 1045249613, %v614_v15  ;;  %v645_v37 = vmax.bf16 %v629_v17, %v613_v13  ;;  %v636_v13 = vmax.bf16 %v620_v8, %v604_v5  ;;  %v632_v53 = vmax.bf16 %v616_v14, %v600_v11  ;;  %v671_v17 = vpop.permute.xlu1 %670  ;;  %v666_v19 = vpop.permute.xlu0 %665 }
 0x161   : > { %v634_v30 = vmax.bf16 %v618_v12, %v602_v7  ;;  %v633_v52 = vmax.bf16 %v617_v54, %v601_v44 }
 0x162   : > { %v646_v25 = vmax.bf16 %v630_v24, %v614_v15  ;;  %v1348_v15 = vld [vmem:[%s1944_s2 + $0x28] sm:$0xff]  }
 0x164   : > { %791 = vmatprep.subr.bf16.mxu1 %v646_v25  ;;  %v676_v18 = vpop.permute.xlu1 %675  ;;  %v681_v24 = vpop.permute.xlu0 %680 }
 0x165   : > { %792 = vmatpush1.bf16.msra.mxu1 %v645_v37 }
 0x166   : > { %793 = vmatprep.subr.bf16.mxu1 %v644_v35 }
 0x168   : > { %v686_v20 = vpop.permute.xlu1 %685  ;;  %v1830_v0 = vpop.permute.xlu0 %969 }
 0x169   : > { %794 = vmatpush1.bf16.msra.mxu1 %v643_v2 }
 0x16a   : > { %795 = vmatprep.subr.bf16.mxu1 %v642_v3 }
 0x16c   : > { %v1828_v25 = vpop.permute.xlu1 %973  ;;  %v1834_v31 = vpop.permute.xlu0 %977 }
 0x16d   : > { %796 = vmatpush1.bf16.msra.mxu1 %v641_v26 }
 0x16e   : > { %797 = vmatprep.subr.bf16.mxu1 %v640_v48 }
 0x170   : > { %v1832_v29 = vpop.permute.xlu1 %690  ;;  %v1838_v37 = vpop.permute.xlu0 %981 }
 0x171   : > { %798 = vmatpush1.bf16.msra.mxu1 %v639_v58 }
 0x172   : > { %799 = vmatprep.subr.bf16.mxu1 %v638_v9 }
 0x174   : > { %v1836_v32 = vpop.permute.xlu1 %695  ;;  %v1842_v36 = vpop.permute.xlu0 %985 }
 0x175   : > { %800 = vmatpush1.bf16.msra.mxu1 %v637_v10 }
 0x176   : > { %801 = vmatprep.subr.bf16.mxu1 %v636_v13 }
 0x178   : > { %v1840_v62 = vpop.permute.xlu1 %700  ;;  %v1846_v60 = vpop.permute.xlu0 %989 }
 0x179   : > { %802 = vmatpush1.bf16.msra.mxu1 %v635_v55 }
 0x17a   : > { %803 = vmatprep.subr.bf16.mxu1 %v634_v30 }
 0x17c   : > { %v1844_v38 = vpop.permute.xlu1 %705  ;;  %v1850_v23 = vpop.permute.xlu0 %993 }
 0x17d   : > { %804 = vmatpush1.bf16.msra.mxu1 %v633_v52 }
 0x17e   : > { %805 = vmatprep.subr.bf16.mxu1 %v632_v53 }
 0x180   : > { %v1848_v3 = vpop.permute.xlu1 %710  ;;  %v1854_v56 = vpop.permute.xlu0 %997 }
 0x181   : > { %806 = vmatpush1.bf16.msra.mxu1 %v631_v39 }
 0x184   : > { %824 = vmatmul.mubr.bf16.vlgmr.msra.gmra.mxu1 %v1343_v43  ;;  %v1852_v21 = vpop.permute.xlu1 %715 }
 0x185   : > { %833 = vmatprep.mubr.bf16.mxu1 %v1413_v1 }
 0x188   : > { %v1857_v52 = vpop.permute.xlu1 %720 }
 0x18c   : > { %834 = vmatmul.mubr.bf16.gmra.mxu1 %v1344_v33 }
 0x18d   : > { %843 = vmatprep.mubr.bf16.mxu1 %v1413_v1 }
 0x194   : > { %844 = vmatmul.mubr.bf16.gmra.mxu1 %v1345_v40 }
 0x195   : > { %853 = vmatprep.mubr.bf16.mxu1 %v1413_v1 }
 0x19c   : > { %854 = vmatmul.mubr.bf16.gmra.mxu1 %v1346_v41 }
 0x19d   : > { %863 = vmatprep.mubr.bf16.mxu1 %v1413_v1 }
 0x1a4   : > { %864 = vmatmul.mubr.bf16.gmra.mxu1 %v1347_v46  ;;  %v1860_v46 = vpop.permute.xlu0 %1001 }
 0x1a5   : > { %873 = vmatprep.mubr.bf16.mxu1 %v1413_v1 }
 0x1ac   : > { %874 = vmatmul.mubr.bf16.gmra.mxu1 %v1348_v15 }
 0x1ad   : > { %883 = vmatprep.mubr.bf16.mxu1 %v1413_v1 }
 0x1b4   : > { %884 = vmatmul.mubr.bf16.gmra.mxu1 %v1349_v16 }
 0x1b5   : > { %893 = vmatprep.mubr.bf16.mxu1 %v1413_v1 }
 0x1bc   : > { %894 = vmatmul.mubr.bf16.gmra.mxu1 %v1350_v27 }
 0x244   : > { %v825_v1 = vpop.f32.mrf.mxu1 }
 0x245   : > { %v826_v26 = vadd.f32 %v825_v1, %v666_v19 }
 0x246   : > { %v827_v34 = vpop.f32.mrf.mxu1 }
 0x247   : > { %v904_v7 = vmul.f32 0.2, %v826_v26  ;;  %v828_v8 = vadd.f32 %v827_v34, %v666_v19 }
 0x248   : > { %v829_v50 = vpop.f32.mrf.mxu1 }
 0x249   : > { %v830_v59 = vadd.f32 %v829_v50, %v671_v17  ;;  %v936_v14 = vmax.f32 %v826_v26, %v904_v7  ;;  %v905_v30 = vmul.f32 0.2, %v828_v8 }
 0x24a   : > { %v831_v35 = vpop.f32.mrf.mxu1 }
 0x24b   : > { %v906_v48 = vmul.f32 0.2, %v830_v59  ;;  %v832_v6 = vadd.f32 %v831_v35, %v671_v17  ;;  %v1032_v19 = vmul.f32 %v1830_v0, %v936_v14 }
 0x24c   : > { %v835_v28 = vpop.f32.mrf.mxu1 }
 0x24d   : > { %v836_v5 = vadd.f32 %v835_v28, %v676_v18  ;;  %v938_v11 = vmax.f32 %v830_v59, %v906_v48  ;;  %v907_v12 = vmul.f32 0.2, %v832_v6 }
 0x24e   : > { %v837_v63 = vpop.f32.mrf.mxu1 }
 0x24f   : > { %v838_v9 = vadd.f32 %v837_v63, %v676_v18  ;;  %v908_v44 = vmul.f32 0.2, %v836_v5  ;;  %v1034_v33 = vmul.f32 %v1828_v25, %v938_v11  ;;  %v939_v40 = vmax.f32 %v832_v6, %v907_v12 }
 0x250   : > { %v839_v2 = vpop.f32.mrf.mxu1 }
 0x251   : > { %v840_v57 = vadd.f32 %v839_v2, %v681_v24  ;;  %v909_v49 = vmul.f32 0.2, %v838_v9  ;;  %v940_v53 = vmax.f32 %v836_v5, %v908_v44  ;;  %v1064_v63 = vadd.f32 %v1034_v33, %v1032_v19 }
 0x252   : > { %v841_v61 = vpop.f32.mrf.mxu1  ;;  %v1035_v2 = vmul.f32 %v1828_v25, %v939_v40 }
 0x253   : > { %v910_v13 = vmul.f32 0.2, %v840_v57  ;;  %v842_v51 = vadd.f32 %v841_v61, %v681_v24  ;;  %v937_v24 = vmax.f32 %v828_v8, %v905_v30  ;;  %v941_v1 = vmax.f32 %v838_v9, %v909_v49 }
 0x254   : > { %v845_v42 = vpop.f32.mrf.mxu1  ;;  %v1036_v34 = vmul.f32 %v1834_v31, %v940_v53 }
 0x255   : > { %v846_v22 = vadd.f32 %v845_v42, %v686_v20  ;;  %v942_v15 = vmax.f32 %v840_v57, %v910_v13  ;;  %v911_v16 = vmul.f32 0.2, %v842_v51  ;;  %v1868_v42 = vpop.permute.xlu1 %725  ;;  %v1033_v48 = vmul.f32 %v1830_v0, %v937_v24  ;;  %v1875_v57 = vpop.permute.xlu0 %1005 }
 0x256   : > { %v847_v47 = vpop.f32.mrf.mxu1  ;;  %v1037_v6 = vmul.f32 %v1834_v31, %v941_v1  ;;  %v1065_v25 = vadd.f32 %v1064_v63, %v1036_v34 }
 0x257   : > { %v912_v39 = vmul.f32 0.2, %v846_v22  ;;  %v848_v41 = vadd.f32 %v847_v47, %v686_v20  ;;  %v1038_v47 = vmul.f32 %v1838_v37, %v942_v15  ;;  %v943_v59 = vmax.f32 %v842_v51, %v911_v16 }
 0x258   : > { %v849_v4 = vpop.f32.mrf.mxu1  ;;  %v1085_v44 = vadd.f32 %v1035_v2, %v1033_v48 }
 0x259   : > { %v850_v54 = vadd.f32 %v849_v4, %v1832_v29  ;;  %v944_v50 = vmax.f32 %v846_v22, %v912_v39  ;;  %v913_v61 = vmul.f32 0.2, %v848_v41  ;;  %v1066_v12 = vadd.f32 %v1065_v25, %v1038_v47  ;;  %v1883_v30 = vpop.permute.xlu1 %730 }
 0x25a   : > { %v851_v45 = vpop.f32.mrf.mxu1  ;;  %v1039_v31 = vmul.f32 %v1838_v37, %v943_v59  ;;  %v1086_v51 = vadd.f32 %v1085_v44, %v1037_v6 }
 0x25b   : > { %v914_v27 = vmul.f32 0.2, %v850_v54  ;;  %v852_v35 = vadd.f32 %v851_v45, %v1832_v29  ;;  %v945_v22 = vmax.f32 %v848_v41, %v913_v61  ;;  %v1887_v41 = vpop.permute.xlu0 %1009 }
 0x25c   : > { %v855_v58 = vpop.f32.mrf.mxu1  ;;  %v1087_v15 = vadd.f32 %v1086_v51, %v1039_v31 }
 0x25d   : > { %v856_v17 = vadd.f32 %v855_v58, %v1836_v32  ;;  %v946_v4 = vmax.f32 %v850_v54, %v914_v27  ;;  %v1040_v58 = vmul.f32 %v1842_v36, %v944_v50  ;;  %v915_v7 = vmul.f32 0.2, %v852_v35  ;;  %v736_v61 = vpop.permute.xlu1 %735 }
 0x25e   : > { %v857_v10 = vpop.f32.mrf.mxu1  ;;  %v1041_v33 = vmul.f32 %v1842_v36, %v945_v22 }
 0x25f   : > { %v916_v26 = vmul.f32 0.2, %v856_v17  ;;  %v858_v29 = vadd.f32 %v857_v10, %v1836_v32  ;;  %v1042_v32 = vmul.f32 %v1846_v60, %v946_v4  ;;  %v1067_v49 = vadd.f32 %v1066_v12, %v1040_v58 }
 0x260   : > { %v859_v55 = vpop.f32.mrf.mxu1  ;;  %v947_v53 = vmax.f32 %v852_v35, %v915_v7 }
 0x261   : > { %v860_v28 = vadd.f32 %v859_v55, %v1840_v62  ;;  %v948_v10 = vmax.f32 %v856_v17, %v916_v26  ;;  %v917_v54 = vmul.f32 0.2, %v858_v29  ;;  %v1068_v16 = vadd.f32 %v1067_v49, %v1042_v32 }
 0x262   : > { %v861_v43 = vpop.f32.mrf.mxu1  ;;  %v1043_v34 = vmul.f32 %v1846_v60, %v947_v53 }
 0x263   : > { %v918_v8 = vmul.f32 0.2, %v860_v28  ;;  %v862_v11 = vadd.f32 %v861_v43, %v1840_v62  ;;  %v1044_v27 = vmul.f32 %v1850_v23, %v948_v10  ;;  %v741_v10 = vpop.permute.xlu1 %740 }
 0x264   : > { %v865_v18 = vpop.f32.mrf.mxu1 }
 0x265   : > { %v866_v45 = vadd.f32 %v865_v18, %v1844_v38  ;;  %v950_v39 = vmax.f32 %v860_v28, %v918_v8  ;;  %v919_v37 = vmul.f32 0.2, %v862_v11  ;;  %v949_v18 = vmax.f32 %v858_v29, %v917_v54  ;;  %v1014_v29 = vpop.permute.xlu0 %1013 }
 0x266   : > { %v867_v20 = vpop.f32.mrf.mxu1  ;;  %v1069_v47 = vadd.f32 %v1068_v16, %v1044_v27 }
 0x267   : > { %v920_v55 = vmul.f32 0.2, %v866_v45  ;;  %v868_v14 = vadd.f32 %v867_v20, %v1844_v38  ;;  %v1046_v36 = vmul.f32 %v1854_v56, %v950_v39  ;;  %v1088_v20 = vadd.f32 %v1087_v15, %v1041_v33 }
 0x268   : > { %v869_v5 = vpop.f32.mrf.mxu1  ;;  %v951_v63 = vmax.f32 %v862_v11, %v919_v37 }
 0x269   : > { %v870_v0 = vadd.f32 %v869_v5, %v1848_v3  ;;  %v952_v19 = vmax.f32 %v866_v45, %v920_v55  ;;  %v921_v24 = vmul.f32 0.2, %v868_v14  ;;  %v1045_v5 = vmul.f32 %v1850_v23, %v949_v18  ;;  %v1018_v39 = vpop.permute.xlu0 %1017 }
 0x26a   : > { %v871_v9 = vpop.f32.mrf.mxu1  ;;  %v1070_v45 = vadd.f32 %v1069_v47, %v1046_v36  ;;  %v1047_v8 = vmul.f32 %v1854_v56, %v951_v63 }
 0x26b   : > { %v922_v40 = vmul.f32 0.2, %v870_v0  ;;  %v872_v38 = vadd.f32 %v871_v9, %v1848_v3  ;;  %v1048_v60 = vmul.f32 %v1860_v46, %v952_v19  ;;  %v953_v48 = vmax.f32 %v868_v14, %v921_v24  ;;  %v1022_v19 = vpop.permute.xlu1 %1021 }
 0x26c   : > { %v875_v13 = vpop.f32.mrf.mxu1 }
 0x26d   : > { %v876_v62 = vadd.f32 %v875_v13, %v1852_v21  ;;  %v954_v2 = vmax.f32 %v870_v0, %v922_v40  ;;  %v923_v3 = vmul.f32 0.2, %v872_v38  ;;  %v1071_v31 = vadd.f32 %v1070_v45, %v1048_v60 }
 0x26e   : > { %v877_v43 = vpop.f32.mrf.mxu1  ;;  %v1049_v32 = vmul.f32 %v1860_v46, %v953_v48 }
 0x26f   : > { %v924_v50 = vmul.f32 0.2, %v876_v62  ;;  %v878_v35 = vadd.f32 %v877_v43, %v1852_v21  ;;  %v1089_v21 = vadd.f32 %v1088_v20, %v1043_v34  ;;  %v1050_v9 = vmul.f32 %v1875_v57, %v954_v2 }
 0x270   : > { %v879_v17 = vpop.f32.mrf.mxu1  ;;  %v955_v22 = vmax.f32 %v872_v38, %v923_v3  ;;  %v1026_v3 = vpop.permute.xlu0 %1025 }
 0x271   : > { %v880_v1 = vadd.f32 %v879_v17, %v1857_v52  ;;  %v956_v25 = vmax.f32 %v876_v62, %v924_v50  ;;  %v925_v58 = vmul.f32 0.2, %v878_v35  ;;  %v1090_v12 = vadd.f32 %v1089_v21, %v1045_v5 }
 0x272   : > { %v881_v28 = vpop.f32.mrf.mxu1  ;;  %v1072_v49 = vadd.f32 %v1071_v31, %v1050_v9  ;;  %v1051_v62 = vmul.f32 %v1875_v57, %v955_v22 }
 0x273   : > { %v926_v59 = vmul.f32 0.2, %v880_v1  ;;  %v882_v4 = vadd.f32 %v881_v28, %v1857_v52  ;;  %v1052_v13 = vmul.f32 %v1887_v41, %v956_v25  ;;  %v957_v51 = vmax.f32 %v878_v35, %v925_v58 }
 0x274   : > { %v885_v26 = vpop.f32.mrf.mxu1  ;;  %v1091_v14 = vadd.f32 %v1090_v12, %v1047_v8  ;;  %v1030_v8 = vpop.permute.xlu1 %1029 }
 0x275   : > { %v886_v6 = vadd.f32 %v885_v26, %v1868_v42  ;;  %v958_v23 = vmax.f32 %v880_v1, %v926_v59  ;;  %v927_v11 = vmul.f32 0.2, %v882_v4  ;;  %v1073_v27 = vadd.f32 %v1072_v49, %v1052_v13 }
 0x276   : > { %v887_v7 = vpop.f32.mrf.mxu1  ;;  %v1092_v40 = vadd.f32 %v1091_v14, %v1049_v32  ;;  %v1053_v38 = vmul.f32 %v1887_v41, %v957_v51  ;;  %v1116_v49 = vlaneseq }
 0x277   : > { %v928_v44 = vmul.f32 0.2, %v886_v6  ;;  %v888_v52 = vadd.f32 %v887_v7, %v1868_v42  ;;  %v1054_v43 = vmul.f32 %v1014_v29, %v958_v23  ;;  %v959_v33 = vmax.f32 %v882_v4, %v927_v11 }
 0x278   : > { %v889_v0 = vpop.f32.mrf.mxu1  ;;  %v1093_v36 = vadd.f32 %v1092_v40, %v1051_v62  ;;  %vm1130_vm1 = vcmp.lt.s32.totalorder %v1116_v49, 256 }
 0x279   : > { %v929_v54 = vmul.f32 0.2, %v888_v52  ;;  %v890_v56 = vadd.f32 %v889_v0, %v1883_v30  ;;  %v960_v53 = vmax.f32 %v886_v6, %v928_v44  ;;  %v1074_v50 = vadd.f32 %v1073_v27, %v1054_v43 }
 0x27a   : > { %v891_v55 = vpop.f32.mrf.mxu1  ;;  %v1055_v57 = vmul.f32 %v1014_v29, %v959_v33  ;;  %v1094_v59 = vadd.f32 %v1093_v36, %v1053_v38  ;;  %v1117_v33 = vshrl.u32 %v1116_v49, 7 }
 0x27b   : > { %v892_v42 = vadd.f32 %v891_v55, %v1883_v30  ;;  %v930_v37 = vmul.f32 0.2, %v890_v56  ;;  %v961_v17 = vmax.f32 %v888_v52, %v929_v54  ;;  %v1056_v1 = vmul.f32 %v1018_v39, %v960_v53 }
 0x27c   : > { %v895_v46 = vpop.f32.mrf.mxu1  ;;  %v1095_v6 = vadd.f32 %v1094_v59, %v1055_v57  ;;  %v1416_v55 = vmov 1966171168  }
 0x27d   : > { %v931_v15 = vmul.f32 0.2, %v892_v42  ;;  %v896_v16 = vadd.f32 %v895_v46, %v736_v61  ;;  %v962_v18 = vmax.f32 %v890_v56, %v930_v37  ;;  %v1057_v4 = vmul.f32 %v1018_v39, %v961_v17 }
 0x27e   : > { %v897_v24 = vpop.f32.mrf.mxu1  ;;  %v1075_v5 = vadd.f32 %v1074_v50, %v1056_v1  ;;  %v1114_v14 = vunpack.c.l.s4 %v1416_v55  ;;  %v1107_v37 = vstv %s1106_s9 }
 0x27f   : > { %v932_v34 = vmul.f32 0.2, %v896_v16  ;;  %v898_v30 = vadd.f32 %v897_v24, %v736_v61  ;;  %v963_v35 = vmax.f32 %v892_v42, %v931_v15  ;;  %v1058_v63 = vmul.f32 %v1022_v19, %v962_v18 }
 0x280   : > { %v899_v28 = vpop.f32.mrf.mxu1  ;;  %v1096_v29 = vadd.f32 %v1095_v6, %v1057_v4  ;;  %v1115_v43 = vunpack.c.0.s8 %v1114_v14 }
 0x281   : > { %v964_v20 = vmax.f32 %v896_v16, %v932_v34  ;;  %v933_v2 = vmul.f32 0.2, %v898_v30  ;;  %v900_v47 = vadd.f32 %v899_v28, %v741_v10  ;;  %v1059_v21 = vmul.f32 %v1022_v19, %v963_v35 }
 0x282   : > { %v901_v41 = vpop.f32.mrf.mxu1  ;;  %v1076_v45 = vadd.f32 %v1075_v5, %v1058_v63  ;;  %v1118_v16 = vsub.s32 %v1115_v43, %v1117_v33 }
 0x283   : > { %v1060_v26 = vmul.f32 %v1026_v3, %v964_v20  ;;  %v965_v60 = vmax.f32 %v898_v30, %v933_v2  ;;  %v934_v48 = vmul.f32 0.2, %v900_v47  ;;  %v902_v61 = vadd.f32 %v901_v41, %v741_v10 }
 0x284   : > { %v1097_v52 = vadd.f32 %v1096_v29, %v1059_v21 }
 0x285   : > { %v966_v25 = vmax.f32 %v900_v47, %v934_v48  ;;  %v1061_v58 = vmul.f32 %v1026_v3, %v965_v60  ;;  %v935_v7 = vmul.f32 0.2, %v902_v61  ;;  %v1077_v44 = vadd.f32 %v1076_v45, %v1060_v26 }
 0x287   : > { %v1062_v9 = vmul.f32 %v1030_v8, %v966_v25  ;;  %v967_v22 = vmax.f32 %v902_v61, %v935_v7  ;;  %v1098_v0 = vadd.f32 %v1097_v52, %v1061_v58 }
 0x289   : > { %v1078_v23 = vadd.f32 %v1077_v44, %v1062_v9  ;;  %v1063_v11 = vmul.f32 %v1030_v8, %v967_v22 }
 0x28b   : > { %v1079_v12 = vrot.slane %v1078_v23, 4  ;;  %v1099_v31 = vadd.f32 %v1098_v0, %v1063_v11 }
 0x28d   : > { %v1080_v32 = vadd.f32 %v1079_v12, %v1078_v23  ;;  %v1100_v13 = vrot.slane %v1099_v31, 4 }
 0x28f   : > { %v1081_v10 = vrot.slane %v1080_v32, 2  ;;  %v1101_v51 = vadd.f32 %v1100_v13, %v1099_v31 }
 0x291   : > { %v1082_v54 = vadd.f32 %v1081_v10, %v1080_v32  ;;  %v1102_v56 = vrot.slane %v1101_v51, 2 }
 0x293   : > { %v1083_v53 = vrot.slane %v1082_v54, 1  ;;  %v1103_v42 = vadd.f32 %v1102_v56, %v1101_v51 }
 0x295   : > { %v1084_v39 = vadd.f32 %v1083_v53, %v1082_v54  ;;  %v1104_v62 = vrot.slane %v1103_v42, 1 }
 0x297   : > { %v1105_v46 = vadd.f32 %v1104_v62, %v1103_v42  ;;  %v1108_v40 = vadd.f32 %v1107_v37, %v1084_v39 }
 0x299   : > { %v1109_v15 = vadd.f32 %v1107_v37, %v1105_v46 }
 0x29b   : > { %v1112_v27 = vcombine.low %v1108_v40, %v1109_v15 }
 0x29d   : > { %v1119_v38 = vrot.slane %v1112_v27, %v1118_v16 }
 0x29f   : > { %v1126_v17 = vrot.slane %v1119_v38, %v1118_v16 }
 0x2a1   : > { %1132 = vst.msk [vmem:[%s219_s12] sm:$0x3] %vm1130_vm1, %v1126_v17 }
 0x2a2   : > { %1364 = shalt.err (!%p1361_p3)
}
 0x2a3   : > { %s1365_s26 = scalar_lea.hbm %s1146_s17, 32  ;;  %s1369_s7 = scalar_lea.hbm %s1947_s5, 96 }
 0x2a4   : > { %p1366_p4 = scmp.ne.s32.totalorder %s1146_s17, %s1365_s26  ;;  %p1370_p9 = scmp.lt.s32.totalorder %s1146_s17, %s1947_s5 }
 0x2a5   : > { %p1371_p10 = scmp.lt.s32.totalorder %s1369_s7, %s1365_s26 }
 0x2a6   : > { %p1367_p7 = pnand %p1366_p4, %p1486_p5 }
 0x2a7   : > { %p1372_p11 = por %p1371_p10, %p1370_p9 }
 0x2a8   : > { %p1368_p8 = pneg %p1367_p7 }
 0x2aa   : > { %p1373_p12 = pnand %p1372_p11, %p1368_p8 }
 0x2ac   : > { %1376 = shalt.err (!%p1373_p12)
}
 0x2ad   : > { %1284 = dma.vmem_to_hbm [thread:$0]  (%p1486_p5), %s1149_s14, 32, %s1146_s17, %s1134_s13  }
 0x2ae PF: > { %p1290_p13 = scmp.ge.s32.totalorder %s1411_s23, 2  ;;  %s1160_s10 = sand.u32 1, %s1399_s20  }
 0x2af   : > { %s1161_s11 = scalar_lea.sflag [#allocation4], %s1160_s10 }
 0x2b0   : > { %p1287_p0 = pnand %p1290_p13, %p1490_p6 }
 0x2b2   : > { %p1288_p1 = pneg %p1287_p0 }
 0x2b4   : > { %1394 = dma.done.wait (%p1288_p1), %s1161_s11, 32  }
 0x2b5   : > { %1396 = vsyncadd (%p1288_p1), %s1161_s11, 4294967264  ;;  %p16_p2 = scmp.ge.s32.totalorder %s1474_s25, 5   ;;  %s1950_s20 = smov %s1403_s21 }
 0x2b6   : > { %s1951_s21 = smov %s1407_s22  ;;  %s1952_s22 = smov %s1484_s28 }
 0x2b7   : > { %s1953_s23 = smov %s1474_s25  ;;  %18 = sbr.rel (!%p16_p2) target bundleno = 5 (0x5), region = 75 }
 0x2bc   :  { %1166 = vsyncpa [#allocation4], 1 }
 0x2bd   :  { %1168 = vsyncpa [#allocation4 + $0x1], 1 }

// kernel: tpu_custom_call.1
= control target key start
LH: loop header
LB: loop body
LE: loop exit
PB: predicated region body
PF: predicated region fallthrough
CT: control target
= control target key end

     0   :  { %s1942_s0 = inlined_call_operand.vmem [shape: f32[768,64], index: 0, kind: input, shape index: {}]   ;;  %s1943_s1 = inlined_call_operand.vmem [shape: bf16[128,64], index: 1, kind: input, shape index: {}]   ;;  %s1944_s2 = inlined_call_operand.vmem [shape: bf16[128,128], index: 2, kind: input, shape index: {}]   ;;  %s1945_s3 = inlined_call_operand.vmem [shape: f32[128,3], index: 3, kind: input, shape index: {}]   ;;  %s1946_s4 = inlined_call_operand.<no memory space> [shape: f32[1], index: 4, kind: input, shape index: {}]   ;;  %s1947_s5 = inlined_call_operand.hbm [shape: f32[1,768], index: 5, kind: output, shape index: {}]  }
   0x1   :  { %10 = sst [smem:[#allocation2]] %s1946_s4 }
   0x2   :  { %11 = vsyncpa [#allocation4], 0 }
   0x3   :  { %13 = vsyncpa [#allocation4 + $0x1], 0  ;;  %s1451_s20 = smov 0   ;;  %s1453_s21 = smov 0  }
   0x4   :  { %s1455_s22 = smov 0   ;;  %s1457_s23 = smov 0  }
   0x5 LB: > { %s1206_s4 = sadd.s32 4294967295, %s1411_s23   ;;  %s1207_s24 = sadd.s32 4294967294, %s1411_s23   ;;  %s1411_s23 = sphi %s1457_s23, %s1953_s23   ;;  %s1407_s22 = sphi %s1455_s22, %s1952_s22   ;;  %s1403_s21 = sphi %s1453_s21, %s1951_s21   ;;  %s1399_s20 = sphi %s1451_s20, %s1950_s20  }
   0x6   : > { %s1474_s25 = sadd.s32 1, %s1411_s23   ;;  %s136_s26 = sadd.s32 1, %s1407_s22 }
   0x7   : > { %s133_s27 = ssub.s32 %s1411_s23, %s1474_s25  ;;  %p146_p0 = scmp.ne.s32.totalorder %s1407_s22, %s1403_s21 }
   0x8   : > { %p134_p1 = scmp.eq.s32.totalorder %s133_s27, 0  ;;  %p147_p2 = scmp.eq.s32.totalorder %s1206_s4, 2 }
   0x9   : > { %p152_p3 = scmp.ne.s32.totalorder %s1403_s21, %s1399_s20  ;;  %p153_p4 = scmp.eq.s32.totalorder %s1207_s24, 2 }
   0xa   : > { %s1484_s28 = scalar_select %p134_p1, %s1407_s22, %s136_s26  }
   0xb   : > { %p1486_p5 = por %p147_p2, %p146_p0  ;;  %p1490_p6 = por %p153_p4, %p152_p3 }
   0xc   : > { %p1210_p7 = scmp.ge.s32.totalorder %s1411_s23, 1  ;;  %p192_p8 = scmp.lt.s32.totalorder %s1411_s23, 4 }
   0xe   : > { %p193_p9 = pnand %p1210_p7, %p192_p8 }
   0xf   : > { %s1496_s6 = sshll.u32 (!%p193_p9), %s1206_s4, 5  ;;  %s1417_s19 = smov (!%p193_p9), [#allocation3]  }
  0x10   : > { %196 = sbr.rel (%p193_p9) target bundleno = 686 (0x2ae), region = 40  ;;  %p221_p10 = scmp.lt.s32.totalorder (!%p193_p9), %s1496_s6, 95 }
  0x11   : > { %s1146_s17 = scalar_lea.hbm (!%p193_p9), %s1947_s5, %s1496_s6  ;;  %s1355_s4 = sshll.u32 (!%p193_p9), %s1417_s19, 4  ;;  %s1356_s4 = int_to_ptr.vmem [resolvable:$false] %s1355_s4 }
  0x12   : > { %s1357_s24 = scalar_lea.vmem (!%p193_p9), %s1356_s4, 64 }
  0x15   : > { %v1502_v0 = vld [vmem:[%s1943_s1] sm:$0xff]   ;;  %vm349_vm0 = vcmask 523264   ;;  %s222_s9 = scalar_select %p221_p10, %s1496_s6, 95  ;;  %v1413_v1 = vmov 0   ;;  %v1534_v21 = vld [vmem:[%s1945_s3 + $0x50] sm:$0xff]  ;;  %v1539_v22 = vld [vmem:[%s1945_s3 + $0x58] sm:$0xff] }
  0x16   : > { %1260 = vmatprep.mubr.msk.bf16.mxu0 %vm349_vm0, %v1502_v0  ;;  %1328 = vset.pattern.permute.xlu1 %v1413_v1  ;;  %v1544_v23 = vld [vmem:[%s1945_s3 + $0x40] sm:$0xff]  ;;  %v556_v25 = vpack.c.bf16 %v1539_v22, %v1534_v21  ;;  %v1551_v26 = vld [vmem:[%s1945_s3 + $0x48] sm:$0xff]  ;;  %v1556_v27 = vld [vmem:[%s1945_s3 + $0x70] sm:$0xff] }
  0x17   : > { %s1213_s10 = sshll.u32 %s222_s9, 3  ;;  %1327 = vset.pattern.permute.xlu0 %v1413_v1  ;;  %823 = vmatprep.mubr.bf16.mxu1 %v1413_v1  ;;  %v1561_v28 = vld [vmem:[%s1945_s3 + $0x78] sm:$0xff]  ;;  %v1569_v30 = vld [vmem:[%s1945_s3 + $0x60] sm:$0xff]  ;;  %v555_v33 = vpack.c.bf16 %v1551_v26, %v1544_v23  ;;  %v1578_v34 = vld [vmem:[%s1945_s3 + $0x68] sm:$0xff]  ;;  %s1106_s9 = sld [smem:[#allocation2]] }
  0x18   : > { %s1512_s13 = scalar_lea.vmem %s1942_s0, %s1213_s10  ;;  %v558_v29 = vpack.c.bf16 %v1561_v28, %v1556_v27  ;;  %586 = vperm.xlu1 %1328, %v556_v25   ;;  %v1583_v35 = vld [vmem:[%s1945_s3 + $0x20] sm:$0xff]  ;;  %v1588_v36 = vld [vmem:[%s1945_s3 + $0x28] sm:$0xff]  ;;  %v557_v37 = vpack.c.bf16 %v1578_v34, %v1569_v30  ;;  %v1595_v38 = vld [vmem:[%s1945_s3 + $0x30] sm:$0xff]  ;;  %s217_s10 = sand.u32 1, %s1403_s21  }
  0x19   : > { %v259_v2 = vld [vmem:[%s1512_s13 + $0xf0] sm:$0xff]  ;;  %v260_v3 = vld [vmem:[%s1512_s13 + $0xf8] sm:$0xff]  ;;  %v257_v7 = vld [vmem:[%s1512_s13 + $0xe0] sm:$0xff]  ;;  %v553_v46 = vpack.c.bf16 %v1588_v36, %v1583_v35  ;;  %s1211_s11 = sshll.u32 %s217_s10, 1 }
  0x1a   : > { %v243_v4 = vld [vmem:[%s1512_s13 + $0x70] sm:$0xff]  ;;  %v276_v5 = vpack.c.bf16 %v260_v3, %v259_v2  ;;  %v244_v6 = vld [vmem:[%s1512_s13 + $0x78] sm:$0xff]  ;;  %v258_v8 = vld [vmem:[%s1512_s13 + $0xe8] sm:$0xff]  ;;  %596 = vperm.xlu0 %1327, %v558_v29   ;;  %s219_s12 = scalar_lea.vmem [#allocation3], %s1211_s11 }
  0x1b   : > { %v268_v9 = vpack.c.bf16 %v244_v6, %v243_v4  ;;  %v275_v10 = vpack.c.bf16 %v258_v8, %v257_v7  ;;  %v241_v11 = vld [vmem:[%s1512_s13 + $0x60] sm:$0xff]  ;;  %v242_v12 = vld [vmem:[%s1512_s13 + $0x68] sm:$0xff]  ;;  %v255_v15 = vld [vmem:[%s1512_s13 + $0xd0] sm:$0xff]  ;;  %s1148_s14 = sshll.u32 %s219_s12, 4  ;;  %s1149_s14 = int_to_ptr.vmem [resolvable:$true] %s1148_s14 }
  0x1c   : > { %1276 = vmatprep.subr.msk.bf16.mxu0 %vm349_vm0, %v276_v5  ;;  %v267_v14 = vpack.c.bf16 %v242_v12, %v241_v11  ;;  %v256_v16 = vld [vmem:[%s1512_s13 + $0xd8] sm:$0xff]  ;;  %v239_v19 = vld [vmem:[%s1512_s13 + $0x50] sm:$0xff]  ;;  %v253_v31 = vld [vmem:[%s1512_s13 + $0xc0] sm:$0xff]  ;;  %581 = vperm.xlu1 %1328, %v555_v33   ;;  %s1351_s18 = scalar_lea.vmem %s1149_s14, 32  ;;  %p1358_p0 = scmp.lt.s32.totalorder %s1149_s14, %s1356_s4 }
  0x1d   : > { %v396_v13 = vsel %vm349_vm0, %v268_v9, 0  ;;  %v274_v18 = vpack.c.bf16 %v256_v16, %v255_v15  ;;  %v240_v20 = vld [vmem:[%s1512_s13 + $0x58] sm:$0xff]  ;;  %v254_v32 = vld [vmem:[%s1512_s13 + $0xc8] sm:$0xff]  ;;  %v237_v40 = vld [vmem:[%s1512_s13 + $0x40] sm:$0xff]  ;;  %p1352_p11 = scmp.ne.s32.totalorder %s1149_s14, %s1351_s18  ;;  %p1359_p1 = scmp.lt.s32.totalorder %s1357_s24, %s1351_s18 }
  0x1e   : > { %1245 = vmatpush3.bf16.xpose.msra.mxu0 %v396_v13  ;;  %v393_v17 = vsel %vm349_vm0, %v267_v14, 0  ;;  %v266_v24 = vpack.c.bf16 %v240_v20, %v239_v19  ;;  %v238_v41 = vld [vmem:[%s1512_s13 + $0x48] sm:$0xff]  ;;  %v1603_v42 = vld [vmem:[%s1945_s3 + $0x38] sm:$0xff]  ;;  %v273_v43 = vpack.c.bf16 %v254_v32, %v253_v31  ;;  %v1608_v44 = vld [vmem:[%s1945_s3] sm:$0xff]  ;;  %591 = vperm.xlu0 %1327, %v557_v37   ;;  %v1414_v37 = vmov 1  }
  0x1f   : > { %1277 = vmatprep.subr.msk.bf16.mxu0 %vm349_vm0, %v275_v10  ;;  %v1613_v45 = vld [vmem:[%s1945_s3 + $0x8] sm:$0xff]  ;;  %v1620_v47 = vld [vmem:[%s1945_s3 + $0x10] sm:$0xff]  ;;  %v1625_v48 = vld [vmem:[%s1945_s3 + $0x18] sm:$0xff]  ;;  %v554_v49 = vpack.c.bf16 %v1603_v42, %v1595_v38  ;;  %v265_v50 = vpack.c.bf16 %v238_v41, %v237_v40  ;;  %p1353_p12 = pnand %p1352_p11, %p1486_p5  ;;  %p1360_p2 = por %p1359_p1, %p1358_p0 }
  0x20   : > { %v390_v39 = vsel %vm349_vm0, %v266_v24, 0  ;;  %v251_v51 = vld [vmem:[%s1512_s13 + $0xb0] sm:$0xff]  ;;  %v252_v52 = vld [vmem:[%s1512_s13 + $0xb8] sm:$0xff]  ;;  %571 = vperm.xlu1 %1328, %v553_v46   ;;  %v551_v53 = vpack.c.bf16 %v1613_v45, %v1608_v44  ;;  %v552_v54 = vpack.c.bf16 %v1625_v48, %v1620_v47  ;;  %v249_v60 = vld [vmem:[%s1512_s13 + $0xa0] sm:$0xff] }
  0x21   : > { %v387_v55 = vsel %vm349_vm0, %v265_v50, 0  ;;  %v272_v56 = vpack.c.bf16 %v252_v52, %v251_v51  ;;  %v235_v57 = vld [vmem:[%s1512_s13 + $0x30] sm:$0xff]  ;;  %v236_v58 = vld [vmem:[%s1512_s13 + $0x38] sm:$0xff]  ;;  %v250_v61 = vld [vmem:[%s1512_s13 + $0xa8] sm:$0xff]  ;;  %v1415_v50 = vmov 2   ;;  %p1354_p13 = pneg %p1353_p12 }
  0x22   : > { %576 = vperm.xlu0 %1327, %v554_v49   ;;  %v264_v59 = vpack.c.bf16 %v236_v58, %v235_v57  ;;  %v271_v63 = vpack.c.bf16 %v250_v61, %v249_v60  ;;  %v233_v2 = vld [vmem:[%s1512_s13 + $0x20] sm:$0xff]  ;;  %v234_v3 = vld [vmem:[%s1512_s13 + $0x28] sm:$0xff]  ;;  %v247_v5 = vld [vmem:[%s1512_s13 + $0x90] sm:$0xff] }
  0x23   : > { %v263_v4 = vpack.c.bf16 %v234_v3, %v233_v2  ;;  %v248_v6 = vld [vmem:[%s1512_s13 + $0x98] sm:$0xff]  ;;  %v231_v9 = vld [vmem:[%s1512_s13 + $0x10] sm:$0xff]  ;;  %v245_v12 = vld [vmem:[%s1512_s13 + $0x80] sm:$0xff]  ;;  %p1361_p3 = pnand %p1360_p2, %p1354_p13 }
  0x24   : > { %561 = vperm.xlu1 %1328, %v551_v53   ;;  %v384_v62 = vsel %vm349_vm0, %v264_v59, 0  ;;  %v270_v8 = vpack.c.bf16 %v248_v6, %v247_v5  ;;  %v232_v10 = vld [vmem:[%s1512_s13 + $0x18] sm:$0xff]  ;;  %v246_v13 = vld [vmem:[%s1512_s13 + $0x88] sm:$0xff]  ;;  %v229_v16 = vld [vmem:[%s1512_s13] sm:$0xff] }
  0x25   : > { %v381_v7 = vsel %vm349_vm0, %v263_v4, 0  ;;  %v262_v11 = vpack.c.bf16 %v232_v10, %v231_v9  ;;  %v269_v15 = vpack.c.bf16 %v246_v13, %v245_v12  ;;  %v1336_v20 = vld [vmem:[%s1943_s1 + $0x8] sm:$0xff]   ;;  %v1337_v24 = vld [vmem:[%s1943_s1 + $0x10] sm:$0xff]   ;;  %v1338_v25 = vld [vmem:[%s1943_s1 + $0x18] sm:$0xff]  }
  0x26   : > { %1247 = vmatpush3.bf16.xpose.msra.mxu0 %v393_v17  ;;  %566 = vperm.xlu0 %1327, %v552_v54   ;;  %v230_v17 = vld [vmem:[%s1512_s13 + $0x8] sm:$0xff]  ;;  %v1341_v31 = vld [vmem:[%s1943_s1 + $0x30] sm:$0xff]   ;;  %v1342_v32 = vld [vmem:[%s1943_s1 + $0x38] sm:$0xff]   ;;  %s1134_s13 = scalar_lea.sflag [#allocation4], %s217_s10 }
  0x27   : > { %1278 = vmatprep.subr.msk.bf16.mxu0 %vm349_vm0, %v274_v18  ;;  %v378_v14 = vsel %vm349_vm0, %v262_v11, 0  ;;  %v261_v18 = vpack.c.bf16 %v230_v17, %v229_v16  ;;  %v1340_v29 = vld [vmem:[%s1943_s1 + $0x28] sm:$0xff]  }
  0x28   : > { %1330 = vset.pattern.permute.xlu1 %v1414_v37 }
  0x29   : > { %v375_v19 = vsel %vm349_vm0, %v261_v18, 0  ;;  %670 = vperm.xlu1 %1330, %v1613_v45  }
  0x2a   : > { %1329 = vset.pattern.permute.xlu0 %v1414_v37 }
  0x2b   : > { %665 = vperm.xlu0 %1329, %v1608_v44  }
  0x2d   : > { %675 = vperm.xlu1 %1330, %v1620_v47  }
  0x2e   : > { %1249 = vmatpush3.bf16.xpose.msra.mxu0 %v390_v39 }
  0x2f   : > { %1279 = vmatprep.subr.msk.bf16.mxu0 %vm349_vm0, %v273_v43  ;;  %680 = vperm.xlu0 %1329, %v1625_v48  }
  0x31   : > { %685 = vperm.xlu1 %1330, %v1583_v35  }
  0x33   : > { %1331 = vset.pattern.permute.xlu0 %v1415_v50 }
  0x34   : > { %969 = vperm.xlu0 %1331, %v1608_v44  }
  0x35   : > { %1332 = vset.pattern.permute.xlu1 %v1415_v50 }
  0x36   : > { %1251 = vmatpush3.bf16.xpose.msra.mxu0 %v387_v55  ;;  %973 = vperm.xlu1 %1332, %v1613_v45  }
  0x37   : > { %1280 = vmatprep.subr.msk.bf16.mxu0 %vm349_vm0, %v272_v56 }
  0x38   : > { %977 = vperm.xlu0 %1331, %v1620_v47  }
  0x3a   : > { %1333 = vset.pattern.permute.xlu1 %v1414_v37 }
  0x3b   : > { %690 = vperm.xlu1 %1333, %v1588_v36  }
  0x3c   : > { %981 = vperm.xlu0 %1331, %v1625_v48  }
  0x3e   : > { %1253 = vmatpush3.bf16.xpose.msra.mxu0 %v384_v62 }
  0x3f   : > { %1281 = vmatprep.subr.msk.bf16.mxu0 %vm349_vm0, %v271_v63  ;;  %695 = vperm.xlu1 %1333, %v1595_v38  }
  0x40   : > { %985 = vperm.xlu0 %1331, %v1583_v35  }
  0x43   : > { %700 = vperm.xlu1 %1333, %v1603_v42  }
  0x44   : > { %989 = vperm.xlu0 %1331, %v1588_v36  }
  0x46   : > { %1255 = vmatpush3.bf16.xpose.msra.mxu0 %v381_v7 }
  0x47   : > { %1282 = vmatprep.subr.msk.bf16.mxu0 %vm349_vm0, %v270_v8  ;;  %705 = vperm.xlu1 %1333, %v1544_v23  }
  0x48   : > { %993 = vperm.xlu0 %1331, %v1595_v38  }
  0x4b   : > { %710 = vperm.xlu1 %1333, %v1551_v26  }
  0x4c   : > { %997 = vperm.xlu0 %1331, %v1603_v42  }
  0x4e   : > { %1257 = vmatpush3.bf16.xpose.msra.mxu0 %v378_v14 }
  0x4f   : > { %1283 = vmatprep.subr.msk.bf16.mxu0 %vm349_vm0, %v269_v15  ;;  %715 = vperm.xlu1 %1333, %v1534_v21  }
  0x50   : > { %1001 = vperm.xlu0 %1331, %v1544_v23  }
  0x53   : > { %720 = vperm.xlu1 %1333, %v1539_v22  }
  0x54   : > { %1005 = vperm.xlu0 %1331, %v1551_v26  }
  0x56   : > { %1259 = vmatpush3.bf16.xpose.msra.mxu0 %v375_v19 }
  0x57   : > { %725 = vperm.xlu1 %1333, %v1569_v30  }
  0x58   : > { %1009 = vperm.xlu0 %1331, %v1534_v21  }
  0x5b   : > { %730 = vperm.xlu1 %1333, %v1578_v34  }
  0x5c   : > { %1013 = vperm.xlu0 %1331, %v1539_v22  }
  0x5d   : > { %1261 = vmatmul.mubr.msk.bf16.vlgmr.msra.gmra.mxu0 %vm349_vm0, %v1502_v0  ;;  %v1339_v0 = vld [vmem:[%s1943_s1 + $0x20] sm:$0xff]  }
  0x5e   : > { %1262 = vmatprep.mubr.msk.bf16.mxu0 %vm349_vm0, %v1336_v20 }
  0x5f   : > { %735 = vperm.xlu1 %1333, %v1556_v27  }
  0x60   : > { %1017 = vperm.xlu0 %1331, %v1569_v30  }
  0x63   : > { %740 = vperm.xlu1 %1333, %v1561_v28  }
  0x64   : > { %1025 = vperm.xlu0 %1331, %v1556_v27  }
  0x65   : > { %1263 = vmatmul.mubr.msk.bf16.gmra.mxu0 %vm349_vm0, %v1336_v20 }
  0x66   : > { %1264 = vmatprep.mubr.msk.bf16.mxu0 %vm349_vm0, %v1337_v24 }
  0x67   : > { %1334 = vset.pattern.permute.xlu1 %v1415_v50 }
  0x68   : > { %1021 = vperm.xlu1 %1334, %v1578_v34  }
  0x6c   : > { %1029 = vperm.xlu1 %1334, %v1561_v28  }
  0x6d   : > { %1265 = vmatmul.mubr.msk.bf16.gmra.mxu0 %vm349_vm0, %v1337_v24 }
  0x6e   : > { %1266 = vmatprep.mubr.msk.bf16.mxu0 %vm349_vm0, %v1338_v25 }
  0x75   : > { %1267 = vmatmul.mubr.msk.bf16.gmra.mxu0 %vm349_vm0, %v1338_v25 }
  0x76   : > { %1268 = vmatprep.mubr.msk.bf16.mxu0 %vm349_vm0, %v1339_v0 }
  0x7d   : > { %1269 = vmatmul.mubr.msk.bf16.gmra.mxu0 %vm349_vm0, %v1339_v0 }
  0x7e   : > { %1270 = vmatprep.mubr.msk.bf16.mxu0 %vm349_vm0, %v1340_v29 }
  0x85   : > { %1271 = vmatmul.mubr.msk.bf16.gmra.mxu0 %vm349_vm0, %v1340_v29 }
  0x86   : > { %1272 = vmatprep.mubr.msk.bf16.mxu0 %vm349_vm0, %v1341_v31 }
  0x8d   : > { %1273 = vmatmul.mubr.msk.bf16.gmra.mxu0 %vm349_vm0, %v1341_v31 }
  0x8e   : > { %1274 = vmatprep.mubr.msk.bf16.mxu0 %vm349_vm0, %v1342_v32 }
  0x93   : > { %v587_v30 = vpop.permute.xlu1 %586 }
  0x95   : > { %1275 = vmatmul.mubr.msk.bf16.gmra.mxu0 %vm349_vm0, %v1342_v32  ;;  %v597_v26 = vpop.permute.xlu0 %596 }
  0x97   : > { %v582_v0 = vpop.permute.xlu1 %581 }
  0x99   : > { %v592_v9 = vpop.permute.xlu0 %591 }
 0x11d   : > { %v1696_v33 = vpop.f32.mrf.mxu0 }
 0x11f   : > { %v1700_v39 = vpop.f32.mrf.mxu0 }
 0x121   : > { %v1702_v40 = vpop.f32.mrf.mxu0 }
 0x122   : > { %v535_v41 = vpack.c.bf16 %v1702_v40, %v1696_v33  ;;  %v1344_v33 = vld [vmem:[%s1944_s2 + $0x8] sm:$0xff]   ;;  %v1345_v40 = vld [vmem:[%s1944_s2 + $0x10] sm:$0xff]  }
 0x123   : > { %v1708_v43 = vpop.f32.mrf.mxu0 }
 0x124   : > { %v536_v46 = vpack.c.bf16 %v1708_v43, %v1700_v39  ;;  %v1343_v43 = vld [vmem:[%s1944_s2] sm:$0xff]  }
 0x125   : > { %v1712_v49 = vpop.f32.mrf.mxu0 }
 0x127   : > { %v1716_v51 = vpop.f32.mrf.mxu0 }
 0x129   : > { %v1719_v52 = vpop.f32.mrf.mxu0 }
 0x12a   : > { %v537_v53 = vpack.c.bf16 %v1719_v52, %v1712_v49 }
 0x12b   : > { %v1724_v54 = vpop.f32.mrf.mxu0 }
 0x12c   : > { %v538_v55 = vpack.c.bf16 %v1724_v54, %v1716_v51 }
 0x12d   : > { %v1730_v56 = vpop.f32.mrf.mxu0 }
 0x12f   : > { %v1732_v57 = vpop.f32.mrf.mxu0 }
 0x131   : > { %v1736_v44 = vpop.f32.mrf.mxu0 }
 0x133   : > { %v1738_v58 = vpop.f32.mrf.mxu0 }
 0x135   : > { %v1742_v45 = vpop.f32.mrf.mxu0 }
 0x137   : > { %v1744_v47 = vpop.f32.mrf.mxu0 }
 0x139   : > { %v1748_v48 = vpop.f32.mrf.mxu0 }
 0x13a   : > { %v541_v28 = vpack.c.bf16 %v1748_v48, %v1742_v45 }
 0x13b   : > { %v1750_v59 = vpop.f32.mrf.mxu0 }
 0x13c   : > { %v542_v34 = vpack.c.bf16 %v1750_v59, %v1744_v47  ;;  %v572_v47 = vpop.permute.xlu1 %571  ;;  %v539_v59 = vpack.c.bf16 %v1736_v44, %v1730_v56 }
 0x13d   : > { %v1754_v60 = vpop.f32.mrf.mxu0 }
 0x13f   : > { %v498_v35 = vpop.f32.mrf.mxu0 }
 0x140   : > { %v562_v56 = vpop.permute.xlu1 %561 }
 0x141   : > { %v1758_v61 = vpop.f32.mrf.mxu0  ;;  %v599_v51 = vadd.bf16 %v562_v56, %v535_v41  ;;  %v1346_v41 = vld [vmem:[%s1944_s2 + $0x18] sm:$0xff]  }
 0x142   : > { %v543_v29 = vpack.c.bf16 %v1758_v61, %v1754_v60  ;;  %v540_v60 = vpack.c.bf16 %v1738_v58, %v1732_v57 }
 0x143   : > { %v502_v36 = vpop.f32.mrf.mxu0  ;;  %v615_v49 = vmul.bf16 1045249613, %v599_v51 }
 0x144   : > { %v544_v18 = vpack.c.bf16 %v502_v36, %v498_v35  ;;  %v577_v36 = vpop.permute.xlu0 %576 }
 0x145   : > { %v506_v62 = vpop.f32.mrf.mxu0  ;;  %v606_v61 = vadd.bf16 %v577_v36, %v542_v34  ;;  %v631_v39 = vmax.bf16 %v615_v49, %v599_v51 }
 0x146   : > { %v608_v50 = vadd.bf16 %v582_v0, %v544_v18 }
 0x147   : > { %v508_v63 = vpop.f32.mrf.mxu0  ;;  %v622_v45 = vmul.bf16 1045249613, %v606_v61 }
 0x149   : > { %v510_v38 = vpop.f32.mrf.mxu0 }
 0x14a   : > { %v545_v16 = vpack.c.bf16 %v510_v38, %v506_v62 }
 0x14b   : > { %v512_v2 = vpop.f32.mrf.mxu0 }
 0x14c   : > { %v546_v11 = vpack.c.bf16 %v512_v2, %v508_v63  ;;  %v609_v31 = vadd.bf16 %v587_v30, %v545_v16  ;;  %v607_v63 = vadd.bf16 %v582_v0, %v543_v29  ;;  %v1349_v16 = vld [vmem:[%s1944_s2 + $0x30] sm:$0xff]  }
 0x14d   : > { %v516_v42 = vpop.f32.mrf.mxu0 }
 0x14e   : > { %v610_v19 = vadd.bf16 %v587_v30, %v546_v11  ;;  %v625_v38 = vmul.bf16 1045249613, %v609_v31  ;;  %v600_v11 = vadd.bf16 %v562_v56, %v536_v46  ;;  %v1347_v46 = vld [vmem:[%s1944_s2 + $0x20] sm:$0xff]  }
 0x14f   : > { %v518_v3 = vpop.f32.mrf.mxu0 }
 0x150   : > { %v626_v62 = vmul.bf16 1045249613, %v610_v19 }
 0x151   : > { %v520_v23 = vpop.f32.mrf.mxu0 }
 0x152   : > { %v547_v22 = vpack.c.bf16 %v520_v23, %v516_v42  ;;  %v624_v42 = vmul.bf16 1045249613, %v608_v50  ;;  %v605_v23 = vadd.bf16 %v577_v36, %v541_v28 }
 0x153   : > { %v522_v4 = vpop.f32.mrf.mxu0 }
 0x154   : > { %v548_v21 = vpack.c.bf16 %v522_v4, %v518_v3  ;;  %v611_v27 = vadd.bf16 %v592_v9, %v547_v22  ;;  %v642_v3 = vmax.bf16 %v626_v62, %v610_v19  ;;  %v623_v4 = vmul.bf16 1045249613, %v607_v63 }
 0x155   : > { %v526_v5 = vpop.f32.mrf.mxu0  ;;  %v640_v48 = vmax.bf16 %v624_v42, %v608_v50  ;;  %v621_v57 = vmul.bf16 1045249613, %v605_v23 }
 0x156   : > { %v612_v12 = vadd.bf16 %v592_v9, %v548_v21  ;;  %v627_v32 = vmul.bf16 1045249613, %v611_v27  ;;  %v603_v21 = vadd.bf16 %v572_v47, %v539_v59  ;;  %v639_v58 = vmax.bf16 %v623_v4, %v607_v63 }
 0x157   : > { %v528_v6 = vpop.f32.mrf.mxu0  ;;  %v638_v9 = vmax.bf16 %v622_v45, %v606_v61 }
 0x158   : > { %v628_v20 = vmul.bf16 1045249613, %v612_v12  ;;  %v643_v2 = vmax.bf16 %v627_v32, %v611_v27  ;;  %v619_v22 = vmul.bf16 1045249613, %v603_v21  ;;  %v1350_v27 = vld [vmem:[%s1944_s2 + $0x38] sm:$0xff]  }
 0x159   : > { %v530_v7 = vpop.f32.mrf.mxu0 }
 0x15a   : > { %v549_v8 = vpack.c.bf16 %v530_v7, %v526_v5  ;;  %v644_v35 = vmax.bf16 %v628_v20, %v612_v12  ;;  %v604_v5 = vadd.bf16 %v572_v47, %v540_v60 }
 0x15b   : > { %v532_v10 = vpop.f32.mrf.mxu0 }
 0x15c   : > { %v613_v13 = vadd.bf16 %v597_v26, %v549_v8  ;;  %v550_v14 = vpack.c.bf16 %v532_v10, %v528_v6  ;;  %v567_v6 = vpop.permute.xlu0 %566  ;;  %v620_v8 = vmul.bf16 1045249613, %v604_v5  ;;  %v637_v10 = vmax.bf16 %v621_v57, %v605_v23 }
 0x15d   : > { %v602_v7 = vadd.bf16 %v567_v6, %v538_v55  ;;  %v601_v44 = vadd.bf16 %v567_v6, %v537_v53  ;;  %v635_v55 = vmax.bf16 %v619_v22, %v603_v21 }
 0x15e   : > { %v614_v15 = vadd.bf16 %v597_v26, %v550_v14  ;;  %v629_v17 = vmul.bf16 1045249613, %v613_v13  ;;  %v641_v26 = vmax.bf16 %v625_v38, %v609_v31  ;;  %v616_v14 = vmul.bf16 1045249613, %v600_v11 }
 0x15f   : > { %v618_v12 = vmul.bf16 1045249613, %v602_v7  ;;  %v617_v54 = vmul.bf16 1045249613, %v601_v44 }
 0x160   : > { %v630_v24 = vmul.bf16 1045249613, %v614_v15  ;;  %v645_v37 = vmax.bf16 %v629_v17, %v613_v13  ;;  %v636_v13 = vmax.bf16 %v620_v8, %v604_v5  ;;  %v632_v53 = vmax.bf16 %v616_v14, %v600_v11  ;;  %v671_v17 = vpop.permute.xlu1 %670  ;;  %v666_v19 = vpop.permute.xlu0 %665 }
 0x161   : > { %v634_v30 = vmax.bf16 %v618_v12, %v602_v7  ;;  %v633_v52 = vmax.bf16 %v617_v54, %v601_v44 }
 0x162   : > { %v646_v25 = vmax.bf16 %v630_v24, %v614_v15  ;;  %v1348_v15 = vld [vmem:[%s1944_s2 + $0x28] sm:$0xff]  }
 0x164   : > { %791 = vmatprep.subr.bf16.mxu1 %v646_v25  ;;  %v676_v18 = vpop.permute.xlu1 %675  ;;  %v681_v24 = vpop.permute.xlu0 %680 }
 0x165   : > { %792 = vmatpush1.bf16.msra.mxu1 %v645_v37 }
 0x166   : > { %793 = vmatprep.subr.bf16.mxu1 %v644_v35 }
 0x168   : > { %v686_v20 = vpop.permute.xlu1 %685  ;;  %v1830_v0 = vpop.permute.xlu0 %969 }
 0x169   : > { %794 = vmatpush1.bf16.msra.mxu1 %v643_v2 }
 0x16a   : > { %795 = vmatprep.subr.bf16.mxu1 %v642_v3 }
 0x16c   : > { %v1828_v25 = vpop.permute.xlu1 %973  ;;  %v1834_v31 = vpop.permute.xlu0 %977 }
 0x16d   : > { %796 = vmatpush1.bf16.msra.mxu1 %v641_v26 }
 0x16e   : > { %797 = vmatprep.subr.bf16.mxu1 %v640_v48 }
 0x170   : > { %v1832_v29 = vpop.permute.xlu1 %690  ;;  %v1838_v37 = vpop.permute.xlu0 %981 }
 0x171   : > { %798 = vmatpush1.bf16.msra.mxu1 %v639_v58 }
 0x172   : > { %799 = vmatprep.subr.bf16.mxu1 %v638_v9 }
 0x174   : > { %v1836_v32 = vpop.permute.xlu1 %695  ;;  %v1842_v36 = vpop.permute.xlu0 %985 }
 0x175   : > { %800 = vmatpush1.bf16.msra.mxu1 %v637_v10 }
 0x176   : > { %801 = vmatprep.subr.bf16.mxu1 %v636_v13 }
 0x178   : > { %v1840_v62 = vpop.permute.xlu1 %700  ;;  %v1846_v60 = vpop.permute.xlu0 %989 }
 0x179   : > { %802 = vmatpush1.bf16.msra.mxu1 %v635_v55 }
 0x17a   : > { %803 = vmatprep.subr.bf16.mxu1 %v634_v30 }
 0x17c   : > { %v1844_v38 = vpop.permute.xlu1 %705  ;;  %v1850_v23 = vpop.permute.xlu0 %993 }
 0x17d   : > { %804 = vmatpush1.bf16.msra.mxu1 %v633_v52 }
 0x17e   : > { %805 = vmatprep.subr.bf16.mxu1 %v632_v53 }
 0x180   : > { %v1848_v3 = vpop.permute.xlu1 %710  ;;  %v1854_v56 = vpop.permute.xlu0 %997 }
 0x181   : > { %806 = vmatpush1.bf16.msra.mxu1 %v631_v39 }
 0x184   : > { %824 = vmatmul.mubr.bf16.vlgmr.msra.gmra.mxu1 %v1343_v43  ;;  %v1852_v21 = vpop.permute.xlu1 %715 }
 0x185   : > { %833 = vmatprep.mubr.bf16.mxu1 %v1413_v1 }
 0x188   : > { %v1857_v52 = vpop.permute.xlu1 %720 }
 0x18c   : > { %834 = vmatmul.mubr.bf16.gmra.mxu1 %v1344_v33 }
 0x18d   : > { %843 = vmatprep.mubr.bf16.mxu1 %v1413_v1 }
 0x194   : > { %844 = vmatmul.mubr.bf16.gmra.mxu1 %v1345_v40 }
 0x195   : > { %853 = vmatprep.mubr.bf16.mxu1 %v1413_v1 }
 0x19c   : > { %854 = vmatmul.mubr.bf16.gmra.mxu1 %v1346_v41 }
 0x19d   : > { %863 = vmatprep.mubr.bf16.mxu1 %v1413_v1 }
 0x1a4   : > { %864 = vmatmul.mubr.bf16.gmra.mxu1 %v1347_v46  ;;  %v1860_v46 = vpop.permute.xlu0 %1001 }
 0x1a5   : > { %873 = vmatprep.mubr.bf16.mxu1 %v1413_v1 }
 0x1ac   : > { %874 = vmatmul.mubr.bf16.gmra.mxu1 %v1348_v15 }
 0x1ad   : > { %883 = vmatprep.mubr.bf16.mxu1 %v1413_v1 }
 0x1b4   : > { %884 = vmatmul.mubr.bf16.gmra.mxu1 %v1349_v16 }
 0x1b5   : > { %893 = vmatprep.mubr.bf16.mxu1 %v1413_v1 }
 0x1bc   : > { %894 = vmatmul.mubr.bf16.gmra.mxu1 %v1350_v27 }
 0x244   : > { %v825_v1 = vpop.f32.mrf.mxu1 }
 0x245   : > { %v826_v26 = vadd.f32 %v825_v1, %v666_v19 }
 0x246   : > { %v827_v34 = vpop.f32.mrf.mxu1 }
 0x247   : > { %v904_v7 = vmul.f32 0.2, %v826_v26  ;;  %v828_v8 = vadd.f32 %v827_v34, %v666_v19 }
 0x248   : > { %v829_v50 = vpop.f32.mrf.mxu1 }
 0x249   : > { %v830_v59 = vadd.f32 %v829_v50, %v671_v17  ;;  %v936_v14 = vmax.f32 %v826_v26, %v904_v7  ;;  %v905_v30 = vmul.f32 0.2, %v828_v8 }
 0x24a   : > { %v831_v35 = vpop.f32.mrf.mxu1 }
 0x24b   : > { %v906_v48 = vmul.f32 0.2, %v830_v59  ;;  %v832_v6 = vadd.f32 %v831_v35, %v671_v17  ;;  %v1032_v19 = vmul.f32 %v1830_v0, %v936_v14 }
 0x24c   : > { %v835_v28 = vpop.f32.mrf.mxu1 }
 0x24d   : > { %v836_v5 = vadd.f32 %v835_v28, %v676_v18  ;;  %v938_v11 = vmax.f32 %v830_v59, %v906_v48  ;;  %v907_v12 = vmul.f32 0.2, %v832_v6 }
 0x24e   : > { %v837_v63 = vpop.f32.mrf.mxu1 }
 0x24f   : > { %v838_v9 = vadd.f32 %v837_v63, %v676_v18  ;;  %v908_v44 = vmul.f32 0.2, %v836_v5  ;;  %v1034_v33 = vmul.f32 %v1828_v25, %v938_v11  ;;  %v939_v40 = vmax.f32 %v832_v6, %v907_v12 }
 0x250   : > { %v839_v2 = vpop.f32.mrf.mxu1 }
 0x251   : > { %v840_v57 = vadd.f32 %v839_v2, %v681_v24  ;;  %v909_v49 = vmul.f32 0.2, %v838_v9  ;;  %v940_v53 = vmax.f32 %v836_v5, %v908_v44  ;;  %v1064_v63 = vadd.f32 %v1034_v33, %v1032_v19 }
 0x252   : > { %v841_v61 = vpop.f32.mrf.mxu1  ;;  %v1035_v2 = vmul.f32 %v1828_v25, %v939_v40 }
 0x253   : > { %v910_v13 = vmul.f32 0.2, %v840_v57  ;;  %v842_v51 = vadd.f32 %v841_v61, %v681_v24  ;;  %v937_v24 = vmax.f32 %v828_v8, %v905_v30  ;;  %v941_v1 = vmax.f32 %v838_v9, %v909_v49 }
 0x254   : > { %v845_v42 = vpop.f32.mrf.mxu1  ;;  %v1036_v34 = vmul.f32 %v1834_v31, %v940_v53 }
 0x255   : > { %v846_v22 = vadd.f32 %v845_v42, %v686_v20  ;;  %v942_v15 = vmax.f32 %v840_v57, %v910_v13  ;;  %v911_v16 = vmul.f32 0.2, %v842_v51  ;;  %v1868_v42 = vpop.permute.xlu1 %725  ;;  %v1033_v48 = vmul.f32 %v1830_v0, %v937_v24  ;;  %v1875_v57 = vpop.permute.xlu0 %1005 }
 0x256   : > { %v847_v47 = vpop.f32.mrf.mxu1  ;;  %v1037_v6 = vmul.f32 %v1834_v31, %v941_v1  ;;  %v1065_v25 = vadd.f32 %v1064_v63, %v1036_v34 }
 0x257   : > { %v912_v39 = vmul.f32 0.2, %v846_v22  ;;  %v848_v41 = vadd.f32 %v847_v47, %v686_v20  ;;  %v1038_v47 = vmul.f32 %v1838_v37, %v942_v15  ;;  %v943_v59 = vmax.f32 %v842_v51, %v911_v16 }
 0x258   : > { %v849_v4 = vpop.f32.mrf.mxu1  ;;  %v1085_v44 = vadd.f32 %v1035_v2, %v1033_v48 }
 0x259   : > { %v850_v54 = vadd.f32 %v849_v4, %v1832_v29  ;;  %v944_v50 = vmax.f32 %v846_v22, %v912_v39  ;;  %v913_v61 = vmul.f32 0.2, %v848_v41  ;;  %v1066_v12 = vadd.f32 %v1065_v25, %v1038_v47  ;;  %v1883_v30 = vpop.permute.xlu1 %730 }
 0x25a   : > { %v851_v45 = vpop.f32.mrf.mxu1  ;;  %v1039_v31 = vmul.f32 %v1838_v37, %v943_v59  ;;  %v1086_v51 = vadd.f32 %v1085_v44, %v1037_v6 }
 0x25b   : > { %v914_v27 = vmul.f32 0.2, %v850_v54  ;;  %v852_v35 = vadd.f32 %v851_v45, %v1832_v29  ;;  %v945_v22 = vmax.f32 %v848_v41, %v913_v61  ;;  %v1887_v41 = vpop.permute.xlu0 %1009 }
 0x25c   : > { %v855_v58 = vpop.f32.mrf.mxu1  ;;  %v1087_v15 = vadd.f32 %v1086_v51, %v1039_v31 }
 0x25d   : > { %v856_v17 = vadd.f32 %v855_v58, %v1836_v32  ;;  %v946_v4 = vmax.f32 %v850_v54, %v914_v27  ;;  %v1040_v58 = vmul.f32 %v1842_v36, %v944_v50  ;;  %v915_v7 = vmul.f32 0.2, %v852_v35  ;;  %v736_v61 = vpop.permute.xlu1 %735 }
 0x25e   : > { %v857_v10 = vpop.f32.mrf.mxu1  ;;  %v1041_v33 = vmul.f32 %v1842_v36, %v945_v22 }
 0x25f   : > { %v916_v26 = vmul.f32 0.2, %v856_v17  ;;  %v858_v29 = vadd.f32 %v857_v10, %v1836_v32  ;;  %v1042_v32 = vmul.f32 %v1846_v60, %v946_v4  ;;  %v1067_v49 = vadd.f32 %v1066_v12, %v1040_v58 }
 0x260   : > { %v859_v55 = vpop.f32.mrf.mxu1  ;;  %v947_v53 = vmax.f32 %v852_v35, %v915_v7 }
 0x261   : > { %v860_v28 = vadd.f32 %v859_v55, %v1840_v62  ;;  %v948_v10 = vmax.f32 %v856_v17, %v916_v26  ;;  %v917_v54 = vmul.f32 0.2, %v858_v29  ;;  %v1068_v16 = vadd.f32 %v1067_v49, %v1042_v32 }
 0x262   : > { %v861_v43 = vpop.f32.mrf.mxu1  ;;  %v1043_v34 = vmul.f32 %v1846_v60, %v947_v53 }
 0x263   : > { %v918_v8 = vmul.f32 0.2, %v860_v28  ;;  %v862_v11 = vadd.f32 %v861_v43, %v1840_v62  ;;  %v1044_v27 = vmul.f32 %v1850_v23, %v948_v10  ;;  %v741_v10 = vpop.permute.xlu1 %740 }
 0x264   : > { %v865_v18 = vpop.f32.mrf.mxu1 }
 0x265   : > { %v866_v45 = vadd.f32 %v865_v18, %v1844_v38  ;;  %v950_v39 = vmax.f32 %v860_v28, %v918_v8  ;;  %v919_v37 = vmul.f32 0.2, %v862_v11  ;;  %v949_v18 = vmax.f32 %v858_v29, %v917_v54  ;;  %v1014_v29 = vpop.permute.xlu0 %1013 }
 0x266   : > { %v867_v20 = vpop.f32.mrf.mxu1  ;;  %v1069_v47 = vadd.f32 %v1068_v16, %v1044_v27 }
 0x267   : > { %v920_v55 = vmul.f32 0.2, %v866_v45  ;;  %v868_v14 = vadd.f32 %v867_v20, %v1844_v38  ;;  %v1046_v36 = vmul.f32 %v1854_v56, %v950_v39  ;;  %v1088_v20 = vadd.f32 %v1087_v15, %v1041_v33 }
 0x268   : > { %v869_v5 = vpop.f32.mrf.mxu1  ;;  %v951_v63 = vmax.f32 %v862_v11, %v919_v37 }
 0x269   : > { %v870_v0 = vadd.f32 %v869_v5, %v1848_v3  ;;  %v952_v19 = vmax.f32 %v866_v45, %v920_v55  ;;  %v921_v24 = vmul.f32 0.2, %v868_v14  ;;  %v1045_v5 = vmul.f32 %v1850_v23, %v949_v18  ;;  %v1018_v39 = vpop.permute.xlu0 %1017 }
 0x26a   : > { %v871_v9 = vpop.f32.mrf.mxu1  ;;  %v1070_v45 = vadd.f32 %v1069_v47, %v1046_v36  ;;  %v1047_v8 = vmul.f32 %v1854_v56, %v951_v63 }
 0x26b   : > { %v922_v40 = vmul.f32 0.2, %v870_v0  ;;  %v872_v38 = vadd.f32 %v871_v9, %v1848_v3  ;;  %v1048_v60 = vmul.f32 %v1860_v46, %v952_v19  ;;  %v953_v48 = vmax.f32 %v868_v14, %v921_v24  ;;  %v1022_v19 = vpop.permute.xlu1 %1021 }
 0x26c   : > { %v875_v13 = vpop.f32.mrf.mxu1 }
 0x26d   : > { %v876_v62 = vadd.f32 %v875_v13, %v1852_v21  ;;  %v954_v2 = vmax.f32 %v870_v0, %v922_v40  ;;  %v923_v3 = vmul.f32 0.2, %v872_v38  ;;  %v1071_v31 = vadd.f32 %v1070_v45, %v1048_v60 }
 0x26e   : > { %v877_v43 = vpop.f32.mrf.mxu1  ;;  %v1049_v32 = vmul.f32 %v1860_v46, %v953_v48 }
 0x26f   : > { %v924_v50 = vmul.f32 0.2, %v876_v62  ;;  %v878_v35 = vadd.f32 %v877_v43, %v1852_v21  ;;  %v1089_v21 = vadd.f32 %v1088_v20, %v1043_v34  ;;  %v1050_v9 = vmul.f32 %v1875_v57, %v954_v2 }
 0x270   : > { %v879_v17 = vpop.f32.mrf.mxu1  ;;  %v955_v22 = vmax.f32 %v872_v38, %v923_v3  ;;  %v1026_v3 = vpop.permute.xlu0 %1025 }
 0x271   : > { %v880_v1 = vadd.f32 %v879_v17, %v1857_v52  ;;  %v956_v25 = vmax.f32 %v876_v62, %v924_v50  ;;  %v925_v58 = vmul.f32 0.2, %v878_v35  ;;  %v1090_v12 = vadd.f32 %v1089_v21, %v1045_v5 }
 0x272   : > { %v881_v28 = vpop.f32.mrf.mxu1  ;;  %v1072_v49 = vadd.f32 %v1071_v31, %v1050_v9  ;;  %v1051_v62 = vmul.f32 %v1875_v57, %v955_v22 }
 0x273   : > { %v926_v59 = vmul.f32 0.2, %v880_v1  ;;  %v882_v4 = vadd.f32 %v881_v28, %v1857_v52  ;;  %v1052_v13 = vmul.f32 %v1887_v41, %v956_v25  ;;  %v957_v51 = vmax.f32 %v878_v35, %v925_v58 }
 0x274   : > { %v885_v26 = vpop.f32.mrf.mxu1  ;;  %v1091_v14 = vadd.f32 %v1090_v12, %v1047_v8  ;;  %v1030_v8 = vpop.permute.xlu1 %1029 }
 0x275   : > { %v886_v6 = vadd.f32 %v885_v26, %v1868_v42  ;;  %v958_v23 = vmax.f32 %v880_v1, %v926_v59  ;;  %v927_v11 = vmul.f32 0.2, %v882_v4  ;;  %v1073_v27 = vadd.f32 %v1072_v49, %v1052_v13 }
 0x276   : > { %v887_v7 = vpop.f32.mrf.mxu1  ;;  %v1092_v40 = vadd.f32 %v1091_v14, %v1049_v32  ;;  %v1053_v38 = vmul.f32 %v1887_v41, %v957_v51  ;;  %v1116_v49 = vlaneseq }
 0x277   : > { %v928_v44 = vmul.f32 0.2, %v886_v6  ;;  %v888_v52 = vadd.f32 %v887_v7, %v1868_v42  ;;  %v1054_v43 = vmul.f32 %v1014_v29, %v958_v23  ;;  %v959_v33 = vmax.f32 %v882_v4, %v927_v11 }
 0x278   : > { %v889_v0 = vpop.f32.mrf.mxu1  ;;  %v1093_v36 = vadd.f32 %v1092_v40, %v1051_v62  ;;  %vm1130_vm1 = vcmp.lt.s32.totalorder %v1116_v49, 256 }
 0x279   : > { %v929_v54 = vmul.f32 0.2, %v888_v52  ;;  %v890_v56 = vadd.f32 %v889_v0, %v1883_v30  ;;  %v960_v53 = vmax.f32 %v886_v6, %v928_v44  ;;  %v1074_v50 = vadd.f32 %v1073_v27, %v1054_v43 }
 0x27a   : > { %v891_v55 = vpop.f32.mrf.mxu1  ;;  %v1055_v57 = vmul.f32 %v1014_v29, %v959_v33  ;;  %v1094_v59 = vadd.f32 %v1093_v36, %v1053_v38  ;;  %v1117_v33 = vshrl.u32 %v1116_v49, 7 }
 0x27b   : > { %v892_v42 = vadd.f32 %v891_v55, %v1883_v30  ;;  %v930_v37 = vmul.f32 0.2, %v890_v56  ;;  %v961_v17 = vmax.f32 %v888_v52, %v929_v54  ;;  %v1056_v1 = vmul.f32 %v1018_v39, %v960_v53 }
 0x27c   : > { %v895_v46 = vpop.f32.mrf.mxu1  ;;  %v1095_v6 = vadd.f32 %v1094_v59, %v1055_v57  ;;  %v1416_v55 = vmov 1966171168  }
 0x27d   : > { %v931_v15 = vmul.f32 0.2, %v892_v42  ;;  %v896_v16 = vadd.f32 %v895_v46, %v736_v61  ;;  %v962_v18 = vmax.f32 %v890_v56, %v930_v37  ;;  %v1057_v4 = vmul.f32 %v1018_v39, %v961_v17 }
 0x27e   : > { %v897_v24 = vpop.f32.mrf.mxu1  ;;  %v1075_v5 = vadd.f32 %v1074_v50, %v1056_v1  ;;  %v1114_v14 = vunpack.c.l.s4 %v1416_v55  ;;  %v1107_v37 = vstv %s1106_s9 }
 0x27f   : > { %v932_v34 = vmul.f32 0.2, %v896_v16  ;;  %v898_v30 = vadd.f32 %v897_v24, %v736_v61  ;;  %v963_v35 = vmax.f32 %v892_v42, %v931_v15  ;;  %v1058_v63 = vmul.f32 %v1022_v19, %v962_v18 }
 0x280   : > { %v899_v28 = vpop.f32.mrf.mxu1  ;;  %v1096_v29 = vadd.f32 %v1095_v6, %v1057_v4  ;;  %v1115_v43 = vunpack.c.0.s8 %v1114_v14 }
 0x281   : > { %v964_v20 = vmax.f32 %v896_v16, %v932_v34  ;;  %v933_v2 = vmul.f32 0.2, %v898_v30  ;;  %v900_v47 = vadd.f32 %v899_v28, %v741_v10  ;;  %v1059_v21 = vmul.f32 %v1022_v19, %v963_v35 }
 0x282   : > { %v901_v41 = vpop.f32.mrf.mxu1  ;;  %v1076_v45 = vadd.f32 %v1075_v5, %v1058_v63  ;;  %v1118_v16 = vsub.s32 %v1115_v43, %v1117_v33 }
 0x283   : > { %v1060_v26 = vmul.f32 %v1026_v3, %v964_v20  ;;  %v965_v60 = vmax.f32 %v898_v30, %v933_v2  ;;  %v934_v48 = vmul.f32 0.2, %v900_v47  ;;  %v902_v61 = vadd.f32 %v901_v41, %v741_v10 }
 0x284   : > { %v1097_v52 = vadd.f32 %v1096_v29, %v1059_v21 }
 0x285   : > { %v966_v25 = vmax.f32 %v900_v47, %v934_v48  ;;  %v1061_v58 = vmul.f32 %v1026_v3, %v965_v60  ;;  %v935_v7 = vmul.f32 0.2, %v902_v61  ;;  %v1077_v44 = vadd.f32 %v1076_v45, %v1060_v26 }
 0x287   : > { %v1062_v9 = vmul.f32 %v1030_v8, %v966_v25  ;;  %v967_v22 = vmax.f32 %v902_v61, %v935_v7  ;;  %v1098_v0 = vadd.f32 %v1097_v52, %v1061_v58 }
 0x289   : > { %v1078_v23 = vadd.f32 %v1077_v44, %v1062_v9  ;;  %v1063_v11 = vmul.f32 %v1030_v8, %v967_v22 }
 0x28b   : > { %v1079_v12 = vrot.slane %v1078_v23, 4  ;;  %v1099_v31 = vadd.f32 %v1098_v0, %v1063_v11 }
 0x28d   : > { %v1080_v32 = vadd.f32 %v1079_v12, %v1078_v23  ;;  %v1100_v13 = vrot.slane %v1099_v31, 4 }
 0x28f   : > { %v1081_v10 = vrot.slane %v1080_v32, 2  ;;  %v1101_v51 = vadd.f32 %v1100_v13, %v1099_v31 }
 0x291   : > { %v1082_v54 = vadd.f32 %v1081_v10, %v1080_v32  ;;  %v1102_v56 = vrot.slane %v1101_v51, 2 }
 0x293   : > { %v1083_v53 = vrot.slane %v1082_v54, 1  ;;  %v1103_v42 = vadd.f32 %v1102_v56, %v1101_v51 }
 0x295   : > { %v1084_v39 = vadd.f32 %v1083_v53, %v1082_v54  ;;  %v1104_v62 = vrot.slane %v1103_v42, 1 }
 0x297   : > { %v1105_v46 = vadd.f32 %v1104_v62, %v1103_v42  ;;  %v1108_v40 = vadd.f32 %v1107_v37, %v1084_v39 }
 0x299   : > { %v1109_v15 = vadd.f32 %v1107_v37, %v1105_v46 }
 0x29b   : > { %v1112_v27 = vcombine.low %v1108_v40, %v1109_v15 }
 0x29d   : > { %v1119_v38 = vrot.slane %v1112_v27, %v1118_v16 }
 0x29f   : > { %v1126_v17 = vrot.slane %v1119_v38, %v1118_v16 }
 0x2a1   : > { %1132 = vst.msk [vmem:[%s219_s12] sm:$0x3] %vm1130_vm1, %v1126_v17 }
 0x2a2   : > { %1364 = shalt.err (!%p1361_p3)
}
 0x2a3   : > { %s1365_s26 = scalar_lea.hbm %s1146_s17, 32  ;;  %s1369_s7 = scalar_lea.hbm %s1947_s5, 96 }
 0x2a4   : > { %p1366_p4 = scmp.ne.s32.totalorder %s1146_s17, %s1365_s26  ;;  %p1370_p9 = scmp.lt.s32.totalorder %s1146_s17, %s1947_s5 }
 0x2a5   : > { %p1371_p10 = scmp.lt.s32.totalorder %s1369_s7, %s1365_s26 }
 0x2a6   : > { %p1367_p7 = pnand %p1366_p4, %p1486_p5 }
 0x2a7   : > { %p1372_p11 = por %p1371_p10, %p1370_p9 }
 0x2a8   : > { %p1368_p8 = pneg %p1367_p7 }
 0x2aa   : > { %p1373_p12 = pnand %p1372_p11, %p1368_p8 }
 0x2ac   : > { %1376 = shalt.err (!%p1373_p12)
}
 0x2ad   : > { %1284 = dma.vmem_to_hbm [thread:$0]  (%p1486_p5), %s1149_s14, 32, %s1146_s17, %s1134_s13  }
 0x2ae PF: > { %p1290_p13 = scmp.ge.s32.totalorder %s1411_s23, 2  ;;  %s1160_s10 = sand.u32 1, %s1399_s20  }
 0x2af   : > { %s1161_s11 = scalar_lea.sflag [#allocation4], %s1160_s10 }
 0x2b0   : > { %p1287_p0 = pnand %p1290_p13, %p1490_p6 }
 0x2b2   : > { %p1288_p1 = pneg %p1287_p0 }
 0x2b4   : > { %1394 = dma.done.wait (%p1288_p1), %s1161_s11, 32  }
 0x2b5   : > { %1396 = vsyncadd (%p1288_p1), %s1161_s11, 4294967264  ;;  %p16_p2 = scmp.ge.s32.totalorder %s1474_s25, 5   ;;  %s1950_s20 = smov %s1403_s21 }
 0x2b6   : > { %s1951_s21 = smov %s1407_s22  ;;  %s1952_s22 = smov %s1484_s28 }
 0x2b7   : > { %s1953_s23 = smov %s1474_s25  ;;  %18 = sbr.rel (!%p16_p2) target bundleno = 5 (0x5), region = 75 }
 0x2bc   :  { %1166 = vsyncpa [#allocation4], 1 }
 0x2bd   :  { %1168 = vsyncpa [#allocation4 + $0x1], 1 }

</bundles_post_ra>
